<compile_context>
chip_gen: v6e
topology: v6e:2x2x1
jax: 0.10.0
libtpu: 0.0.40
codegen_flags: <defaults>
</compile_context>

<pallas_src>
import jax
import jax.numpy as jnp
from jax.experimental import pallas as pl
from jax.experimental.pallas import tpu as pltpu


# ----------------------------------------------------------------------------
# Model / layout constants
# ----------------------------------------------------------------------------
DIM = 32
LAYERS = 2
K_HOPS = 4
N_NODE_FEAT = 12     # => 8 (z_emb) + 12 + 21 (rand_feature) + 1 (bias lane) = 42
RW_SIZE = 21
N_EDGE_FEAT = 4

X_IN_LANES = 48      # 42 real lanes padded to 48 (multiple of 16, exact zero-pad)
EDGE_PAD = 16        # edge-feature contraction dim 4 -> 16 (zero-padded, exact)
HOP_PAD = 16         # K+1 = 5 hop-bias columns -> 16 (zero-padded, exact)

# Packed-parameter buffer layout (rows of a [PBUF_ROWS, DIM] bf16 buffer; all
# section offsets are multiples of 16 so bf16 sublane slices stay aligned).
OFF_INIT = 0
INIT_ROWS = X_IN_LANES                                   # 48: init_proj W (41) + bias row (1) + pad
OFF_BLOCKS = OFF_INIT + INIT_ROWS                        # 48
BLOCK_ROWS = (K_HOPS + 1) * DIM + EDGE_PAD + HOP_PAD     # 192 per GCNE block
OFF_JK = OFF_BLOCKS + LAYERS * BLOCK_ROWS                # 432: 3 x [32,32] JK chunks
OFF_JKB = OFF_JK + (LAYERS + 1) * DIM                    # 528: JK bias row
PBUF_ROWS = OFF_JKB + 16                                 # 544


def _wconv_off(l, i):
    return OFF_BLOCKS + l * BLOCK_ROWS + i * DIM


def _wef_off(l):
    return OFF_BLOCKS + l * BLOCK_ROWS + (K_HOPS + 1) * DIM


def _bmat_off(l):
    return _wef_off(l) + EDGE_PAD


# ----------------------------------------------------------------------------
# Fused Pallas kernel (one grid step == one node bucket)
# ----------------------------------------------------------------------------
def _gcne_fused_kernel(x_in_ref, a_ref, rows_ref, s_ref, ea_ref, pool_ref,
                       pbuf_ref, out_ref):
    f32, bf16 = jnp.float32, jnp.bfloat16
    nb = x_in_ref.shape[1]                       # nodes per bucket (static)

    def w(off, n):                               # static, sublane-aligned weight slice
        return pbuf_ref[off:off + n, :]

    # QM9InputEncoder.init_proj — bias folded into the weight via the constant-1 lane.
    x0 = jnp.dot(x_in_ref[0], w(OFF_INIT, INIT_ROWS),
                 preferred_element_type=f32)                             # [NB, D] f32

    # Per-node normalized aggregate of raw edge features (shared by both blocks):
    # m = S_norm @ edge_attr ; the model/conv edge linears are folded into w_ef below.
    m_bf = jnp.dot(s_ref[0], ea_ref[0],
                   preferred_element_type=f32).astype(bf16)              # [NB, EDGE_PAD]
    rows = rows_ref[0]                                                   # [NB, HOP_PAD] bf16 (A_i row-sums)
    a_vcat = a_ref[0]                                                    # [(K+1)*NB, NB] bf16

    # JK='concat' accumulated on the fly: y = sum_j outs[j] @ jk_w[j] (+ jk_b at the end)
    h = x0
    y = jnp.dot(x0.astype(bf16), w(OFF_JK, DIM), preferred_element_type=f32)

    for l in range(LAYERS):                                              # static loop over blocks
        # Folded edge-feature aggregate + folded per-hop bias aggregate (2 tiny matmuls,
        # replaces 5 broadcast bias adds per layer).
        acc = (jnp.dot(m_bf, w(_wef_off(l), EDGE_PAD), preferred_element_type=f32)
               + jnp.dot(rows, w(_bmat_off(l), HOP_PAD), preferred_element_type=f32))

        # Hop aggregation FIRST: one MXU matmul over all K+1 adjacencies stacked along
        # sublanes (good row fill), then K+1 sublane-aligned per-hop projections.
        p_bf = jnp.dot(a_vcat, h.astype(bf16),
                       preferred_element_type=f32).astype(bf16)          # [(K+1)*NB, D]
        for i in range(K_HOPS + 1):
            acc = acc + jnp.dot(p_bf[i * nb:(i + 1) * nb, :],
                                w(_wconv_off(l, i), DIM),
                                preferred_element_type=f32)
        h = jnp.maximum(acc, 0.0)                                        # ReLU (dropout = identity)
        y = y + jnp.dot(h.astype(bf16), w(OFF_JK + (l + 1) * DIM, DIM),
                        preferred_element_type=f32)

    y = y + pbuf_ref[OFF_JKB:OFF_JKB + 1, :].astype(f32)                 # JK bias (per node, f32 add)
    # global_add_pool over this bucket's graphs.
    out_ref[0] = jnp.dot(pool_ref[0], y.astype(bf16),
                         preferred_element_type=f32).astype(out_ref.dtype)


def gcne_fused_call(pbuf, x_in, a_vcat, rowsums, s_norm, ea, pool):
    nbuckets, nb = x_in.shape[0], x_in.shape[1]
    eb = ea.shape[1]
    gb = pool.shape[1]

    def tile3(d1, d2):
        return pl.BlockSpec((1, d1, d2), lambda b: (b, 0, 0))

    # NOTE(perf): per-step VMEM ~ 2 * (5*NB*NB + NB*EB + ...) bf16 bytes; re-derive the
    # bucket size NB against 32 MiB scoped / 64 MiB physical VMEM when scaling up on v7x.
    return pl.pallas_call(
        _gcne_fused_kernel,
        out_shape=jax.ShapeDtypeStruct((nbuckets, gb, DIM), jnp.float32),
        grid=(nbuckets,),
        in_specs=[
            tile3(nb, X_IN_LANES),                 # x_in           [NBK, NB, 48]
            tile3((K_HOPS + 1) * nb, nb),          # a_vcat         [NBK, 5*NB, NB]
            tile3(nb, HOP_PAD),                    # rowsums        [NBK, NB, 16]
            tile3(nb, eb),                         # s_norm         [NBK, NB, EB]
            tile3(eb, EDGE_PAD),                   # edge_attr      [NBK, EB, 16]
            tile3(gb, nb),                         # pool           [NBK, GB, NB]
            pl.BlockSpec((PBUF_ROWS, DIM), lambda b: (0, 0)),   # packed params (fetched once)
        ],
        out_specs=pl.BlockSpec((1, gb, DIM), lambda b: (b, 0, 0)),
        compiler_params=pltpu.CompilerParams(
            dimension_semantics=("parallel",)),    # buckets are independent -> both TCs on v7x
    )(x_in, a_vcat, rowsums, s_norm, ea, pool, pbuf)


# ----------------------------------------------------------------------------
# Glue: dense per-bucket graph operators (built ONCE, outside the hot path)
# ----------------------------------------------------------------------------
def build_norm_adj(edge_index, num_nodes):
    """Dense A with self loops and symmetric GCN norm: A[tgt, src] = d^-1/2[src]*d^-1/2[tgt].
    Duplicate edges accumulate, matching PyG's un-coalesced add_self_loops + degree path."""
    row, col = edge_index[0], edge_index[1]
    sl = jnp.arange(num_nodes, dtype=row.dtype)
    row_sl = jnp.concatenate([row, sl])
    col_sl = jnp.concatenate([col, sl])
    deg = jnp.zeros((num_nodes,), jnp.float32).at[col_sl].add(1.0)
    dinv = jnp.where(deg > 0, 1.0 / jnp.sqrt(deg), 0.0)
    norm = dinv[row_sl] * dinv[col_sl]
    return jnp.zeros((num_nodes, num_nodes), jnp.float32).at[col_sl, row_sl].add(norm)


def build_edge_scatter(edge_index, num_nodes):
    """S[N, E]: S[target_e, e] = norm_e (degrees computed with self loops).
    Self-loop rows are omitted: conv.edge_emb has bias=False, so zero-filled self-loop
    edge_attr embeds exactly to zero."""
    row, col = edge_index[0], edge_index[1]
    E = row.shape[0]
    sl = jnp.arange(num_nodes, dtype=row.dtype)
    deg = jnp.zeros((num_nodes,), jnp.float32).at[jnp.concatenate([col, sl])].add(1.0)
    dinv = jnp.where(deg > 0, 1.0 / jnp.sqrt(deg), 0.0)
    norm = dinv[row] * dinv[col]
    return jnp.zeros((num_nodes, E), jnp.float32).at[col, jnp.arange(E)].add(norm)


def build_bucket_operators(edge_index, hop_edge_indices, num_nodes):
    a_list = [build_norm_adj(edge_index, num_nodes)] + \
             [build_norm_adj(h, num_nodes) for h in hop_edge_indices]
    a_vcat = jnp.concatenate(a_list, axis=0)                               # [(K+1)*NB, NB]
    rowsums = jnp.stack([a.sum(axis=1) for a in a_list], axis=1)           # [NB, K+1]
    rowsums = jnp.pad(rowsums, ((0, 0), (0, HOP_PAD - (K_HOPS + 1))))      # [NB, 16]
    s_norm = build_edge_scatter(edge_index, num_nodes)                     # [NB, E]
    return a_vcat, rowsums, s_norm


# ----------------------------------------------------------------------------
# Parameters: deterministic synthetic init + packing into one bf16 buffer
# ----------------------------------------------------------------------------
def init_params(key):
    def nrm(k, shape, scale=0.1):
        return scale * jax.random.normal(k, shape, dtype=jnp.float32)

    keys = iter(jax.random.split(key, 64))
    params = {
        "z_table": nrm(next(keys), (1000, 8)),
        "init_proj_w": nrm(next(keys), (8 + N_NODE_FEAT + RW_SIZE, DIM)),
        "init_proj_b": nrm(next(keys), (DIM,)),
        "edge_emb_w": nrm(next(keys), (N_EDGE_FEAT, DIM)),          # bias=False
        "jk_w": nrm(next(keys), ((LAYERS + 1) * DIM, DIM)),
        "jk_b": nrm(next(keys), (DIM,)),
        "blocks": [],
    }
    for _ in range(LAYERS):
        W = nrm(next(keys), (K_HOPS, DIM, DIM))                      # convs[i].lin.weight ([in,out])
        b = nrm(next(keys), (K_HOPS, DIM))                           # convs[i].lin.bias
        We0 = nrm(next(keys), (DIM, DIM))                            # convs[0].edge_emb.weight
        params["blocks"].append({"W": W, "b": b, "We0": We0})
    return params


def prepare_packed_params(p):
    """Pack every weight the kernel needs into one [PBUF_ROWS, DIM] bf16 buffer (one DMA)."""
    buf = jnp.zeros((PBUF_ROWS, DIM), jnp.float32)
    nfeat = p["init_proj_w"].shape[0]                                # 41
    buf = buf.at[OFF_INIT:OFF_INIT + nfeat].set(p["init_proj_w"])
    buf = buf.at[OFF_INIT + nfeat].set(p["init_proj_b"])             # bias row (constant-1 lane)
    for l, blk in enumerate(p["blocks"]):
        W, b, We0 = blk["W"], blk["b"], blk["We0"]
        # 5 applications: edge conv uses convs[0]; hop i uses convs[i]  ->  [W0, W0, W1, W2, W3]
        w5 = jnp.concatenate([W[0:1], W], axis=0).reshape((K_HOPS + 1) * DIM, DIM)
        b5 = jnp.concatenate([b[0:1], b], axis=0)                    # [5, D]
        buf = buf.at[_wconv_off(l, 0):_wconv_off(l, 0) + (K_HOPS + 1) * DIM].set(w5)
        buf = buf.at[_wef_off(l):_wef_off(l) + N_EDGE_FEAT].set(p["edge_emb_w"] @ We0)
        buf = buf.at[_bmat_off(l):_bmat_off(l) + (K_HOPS + 1)].set(b5)
    buf = buf.at[OFF_JK:OFF_JK + (LAYERS + 1) * DIM].set(p["jk_w"])
    buf = buf.at[OFF_JKB].set(p["jk_b"])
    return {"z_table": p["z_table"], "pbuf": buf.astype(jnp.bfloat16)}


# ----------------------------------------------------------------------------
# Forward pass (jitted): embedding gather + concat in glue, everything else fused
# ----------------------------------------------------------------------------
def gcne_model_forward(fp, x_nodes, rand_feature, z, edge_attr,
                       a_vcat, rowsums, s_norm, pool):
    nbuckets, _, nb = a_vcat.shape[0], a_vcat.shape[1], a_vcat.shape[2]
    eb = s_norm.shape[2]
    ntot = nbuckets * nb
    # feature fusion (no 'central_to_subgraph_feats') + QM9InputEncoder concat order:
    # [z_emb | x | rand_feature | 1 (bias lane)]  padded to X_IN_LANES.
    z_emb = fp["z_table"][z]                                          # [Ntot, 8]
    ones = jnp.ones((ntot, 1), jnp.float32)
    x_in = jnp.concatenate([z_emb, x_nodes, rand_feature, ones], axis=-1)
    x_in = jnp.pad(x_in, ((0, 0), (0, X_IN_LANES - x_in.shape[1])))
    x_in = x_in.reshape(nbuckets, nb, X_IN_LANES).astype(jnp.bfloat16)
    ea = jnp.pad(edge_attr, ((0, 0), (0, EDGE_PAD - N_EDGE_FEAT)))
    ea = ea.reshape(nbuckets, eb, EDGE_PAD).astype(jnp.bfloat16)
    out = gcne_fused_call(fp["pbuf"], x_in, a_vcat, rowsums, s_norm, ea, pool)
    return out.reshape(nbuckets * pool.shape[1], DIM)                 # [num_graphs, D]


# ----------------------------------------------------------------------------
# Main
# ----------------------------------------------------------------------------
def random_edges(k, eb, gb, pg):
    ks, kd = jax.random.split(k)
    src = jax.random.randint(ks, (eb,), 0, pg)
    dst = jax.random.randint(kd, (eb,), 0, pg)
    gid = (jnp.arange(eb) % gb) * pg
    return jnp.stack([src + gid, dst + gid]).astype(jnp.int32)


if __name__ == "__main__":
    key = jax.random.PRNGKey(0)
    k_param, k_x, k_rw, k_z, k_ea, k_graph = jax.random.split(key, 6)

    NBUCKETS, NB, GB, EB = 2, 128, 8, 128         # buckets, nodes/bucket, graphs/bucket, edges/bucket
    PG = NB // GB                                 # 16 nodes per graph
    NTOT = NBUCKETS * NB

    x_nodes = jax.random.normal(k_x, (NTOT, N_NODE_FEAT), dtype=jnp.float32)
    rand_feature = jax.random.normal(k_rw, (NTOT, RW_SIZE), dtype=jnp.float32)
    z = jax.random.randint(k_z, (NTOT,), 0, 1000)
    edge_attr = jax.random.normal(k_ea, (NBUCKETS * EB, N_EDGE_FEAT), dtype=jnp.float32)

    # Per-bucket graph operators, built once (hoisted out of the per-forward hot path).
    gkeys = jax.random.split(k_graph, NBUCKETS * (K_HOPS + 1)).reshape(NBUCKETS, K_HOPS + 1, 2)
    a_all, rows_all, s_all = [], [], []
    for b in range(NBUCKETS):
        ei = random_edges(gkeys[b, 0], EB, GB, PG)
        hops = [random_edges(gkeys[b, 1 + i], EB, GB, PG) for i in range(K_HOPS)]
        a_v, rsum, s_n = build_bucket_operators(ei, hops, NB)
        a_all.append(a_v), rows_all.append(rsum), s_all.append(s_n)
    a_vcat = jnp.stack(a_all).astype(jnp.bfloat16)                    # [NBK, 5*NB, NB]
    rowsums = jnp.stack(rows_all).astype(jnp.bfloat16)                # [NBK, NB, 16]
    s_norm = jnp.stack(s_all).astype(jnp.bfloat16)                    # [NBK, NB, EB]
    batch_local = jnp.arange(NB) // PG
    pool = (batch_local[None, :] == jnp.arange(GB)[:, None]).astype(jnp.float32)
    pool = jnp.tile(pool[None], (NBUCKETS, 1, 1)).astype(jnp.bfloat16)  # [NBK, GB, NB]

    params = init_params(k_param)
    fp = prepare_packed_params(params)

    fwd = jax.jit(gcne_model_forward)
    out = fwd(fp, x_nodes, rand_feature, z, edge_attr, a_vcat, rowsums, s_norm, pool)
    out = jax.block_until_ready(out)
    assert out.shape == (NBUCKETS * GB, DIM) and out.dtype == jnp.float32
    assert bool(jnp.all(jnp.isfinite(out)))
    print("KERNEL_OK")
</pallas_src>

<mosaic_0001>
module attributes {stable_mosaic.version = 11 : i64} {
  func.func @_gcne_fused_kernel(%arg0: i32, %arg1: memref<1x128x48xbf16, #tpu.memory_space<vmem>>, %arg2: memref<1x640x128xbf16, #tpu.memory_space<vmem>>, %arg3: memref<1x128x16xbf16, #tpu.memory_space<vmem>>, %arg4: memref<1x128x128xbf16, #tpu.memory_space<vmem>>, %arg5: memref<1x128x16xbf16, #tpu.memory_space<vmem>>, %arg6: memref<1x8x128xbf16, #tpu.memory_space<vmem>>, %arg7: memref<544x32xbf16, #tpu.memory_space<vmem>>, %arg8: memref<1x8x32xf32, #tpu.memory_space<vmem>>) attributes {dimension_semantics = [#tpu.dimension_semantics<parallel>], iteration_bounds = array<i64: 2>, scalar_prefetch = 0 : i64, scratch_operands = 0 : i64, tpu.core_type = #tpu.core_type<tc>, window_params = [{transform_indices = @transform_0, window_bounds = array<i64: 1, 128, 48>}, {transform_indices = @transform_1, window_bounds = array<i64: 1, 640, 128>}, {transform_indices = @transform_2, window_bounds = array<i64: 1, 128, 16>}, {transform_indices = @transform_3, window_bounds = array<i64: 1, 128, 128>}, {transform_indices = @transform_4, window_bounds = array<i64: 1, 128, 16>}, {transform_indices = @transform_5, window_bounds = array<i64: 1, 8, 128>}, {pipeline_mode = #tpu.pipeline_mode<synchronous>, transform_indices = @transform_6, window_bounds = array<i64: 544, 32>}, {transform_indices = @transform_7, window_bounds = array<i64: 1, 8, 32>}]} {
    %c0 = arith.constant 0 : index
    %c0_0 = arith.constant 0 : index
    %c0_1 = arith.constant 0 : index
    %0 = vector.load %arg1[%c0, %c0_0, %c0_1] : memref<1x128x48xbf16, #tpu.memory_space<vmem>>, vector<1x128x48xbf16>
    %1 = vector.shape_cast %0 : vector<1x128x48xbf16> to vector<128x48xbf16>
    %c0_2 = arith.constant 0 : index
    %c0_3 = arith.constant 0 : index
    %2 = vector.load %arg7[%c0_2, %c0_3] : memref<544x32xbf16, #tpu.memory_space<vmem>>, vector<48x32xbf16>
    %cst = arith.constant dense<0.000000e+00> : vector<128x32xf32>
    %3 = tpu.matmul %1, %2, %cst {dimension_numbers = #tpu.dot_dimension_numbers<[1], [0], [0], [1], [0, 0, 1, 1], [], []>} : vector<128x48xbf16>, vector<48x32xbf16>, vector<128x32xf32> -> vector<128x32xf32>
    %c0_4 = arith.constant 0 : index
    %c0_5 = arith.constant 0 : index
    %c0_6 = arith.constant 0 : index
    %4 = vector.load %arg4[%c0_4, %c0_5, %c0_6] : memref<1x128x128xbf16, #tpu.memory_space<vmem>>, vector<1x128x128xbf16>
    %5 = vector.shape_cast %4 : vector<1x128x128xbf16> to vector<128x128xbf16>
    %c0_7 = arith.constant 0 : index
    %c0_8 = arith.constant 0 : index
    %c0_9 = arith.constant 0 : index
    %6 = vector.load %arg5[%c0_7, %c0_8, %c0_9] : memref<1x128x16xbf16, #tpu.memory_space<vmem>>, vector<1x128x16xbf16>
    %7 = vector.shape_cast %6 : vector<1x128x16xbf16> to vector<128x16xbf16>
    %cst_10 = arith.constant dense<0.000000e+00> : vector<128x16xf32>
    %8 = tpu.matmul %5, %7, %cst_10 {dimension_numbers = #tpu.dot_dimension_numbers<[1], [0], [0], [1], [0, 0, 1, 1], [], []>} : vector<128x128xbf16>, vector<128x16xbf16>, vector<128x16xf32> -> vector<128x16xf32>
    %9 = arith.truncf %8 : vector<128x16xf32> to vector<128x16xbf16>
    %c0_11 = arith.constant 0 : index
    %c0_12 = arith.constant 0 : index
    %c0_13 = arith.constant 0 : index
    %10 = vector.load %arg3[%c0_11, %c0_12, %c0_13] : memref<1x128x16xbf16, #tpu.memory_space<vmem>>, vector<1x128x16xbf16>
    %11 = vector.shape_cast %10 : vector<1x128x16xbf16> to vector<128x16xbf16>
    %c0_14 = arith.constant 0 : index
    %c0_15 = arith.constant 0 : index
    %c0_16 = arith.constant 0 : index
    %12 = vector.load %arg2[%c0_14, %c0_15, %c0_16] : memref<1x640x128xbf16, #tpu.memory_space<vmem>>, vector<1x640x128xbf16>
    %13 = vector.shape_cast %12 : vector<1x640x128xbf16> to vector<640x128xbf16>
    %14 = arith.truncf %3 : vector<128x32xf32> to vector<128x32xbf16>
    %c432 = arith.constant 432 : index
    %c0_17 = arith.constant 0 : index
    %15 = vector.load %arg7[%c432, %c0_17] : memref<544x32xbf16, #tpu.memory_space<vmem>>, vector<32x32xbf16>
    %cst_18 = arith.constant dense<0.000000e+00> : vector<128x32xf32>
    %16 = tpu.matmul %14, %15, %cst_18 {dimension_numbers = #tpu.dot_dimension_numbers<[1], [0], [0], [1], [0, 0, 1, 1], [], []>} : vector<128x32xbf16>, vector<32x32xbf16>, vector<128x32xf32> -> vector<128x32xf32>
    %c208 = arith.constant 208 : index
    %c0_19 = arith.constant 0 : index
    %17 = vector.load %arg7[%c208, %c0_19] : memref<544x32xbf16, #tpu.memory_space<vmem>>, vector<16x32xbf16>
    %cst_20 = arith.constant dense<0.000000e+00> : vector<128x32xf32>
    %18 = tpu.matmul %9, %17, %cst_20 {dimension_numbers = #tpu.dot_dimension_numbers<[1], [0], [0], [1], [0, 0, 1, 1], [], []>} : vector<128x16xbf16>, vector<16x32xbf16>, vector<128x32xf32> -> vector<128x32xf32>
    %c224 = arith.constant 224 : index
    %c0_21 = arith.constant 0 : index
    %19 = vector.load %arg7[%c224, %c0_21] : memref<544x32xbf16, #tpu.memory_space<vmem>>, vector<16x32xbf16>
    %cst_22 = arith.constant dense<0.000000e+00> : vector<128x32xf32>
    %20 = tpu.matmul %11, %19, %cst_22 {dimension_numbers = #tpu.dot_dimension_numbers<[1], [0], [0], [1], [0, 0, 1, 1], [], []>} : vector<128x16xbf16>, vector<16x32xbf16>, vector<128x32xf32> -> vector<128x32xf32>
    %21 = arith.addf %18, %20 : vector<128x32xf32>
    %22 = arith.truncf %3 : vector<128x32xf32> to vector<128x32xbf16>
    %cst_23 = arith.constant dense<0.000000e+00> : vector<640x32xf32>
    %23 = tpu.matmul %13, %22, %cst_23 {dimension_numbers = #tpu.dot_dimension_numbers<[1], [0], [0], [1], [0, 0, 1, 1], [], []>} : vector<640x128xbf16>, vector<128x32xbf16>, vector<640x32xf32> -> vector<640x32xf32>
    %24 = arith.truncf %23 : vector<640x32xf32> to vector<640x32xbf16>
    %25 = vector.extract_strided_slice %24 {offsets = [0, 0], sizes = [128, 32], strides = [1, 1]} : vector<640x32xbf16> to vector<128x32xbf16>
    %c48 = arith.constant 48 : index
    %c0_24 = arith.constant 0 : index
    %26 = vector.load %arg7[%c48, %c0_24] : memref<544x32xbf16, #tpu.memory_space<vmem>>, vector<32x32xbf16>
    %cst_25 = arith.constant dense<0.000000e+00> : vector<128x32xf32>
    %27 = tpu.matmul %25, %26, %cst_25 {dimension_numbers = #tpu.dot_dimension_numbers<[1], [0], [0], [1], [0, 0, 1, 1], [], []>} : vector<128x32xbf16>, vector<32x32xbf16>, vector<128x32xf32> -> vector<128x32xf32>
    %28 = arith.addf %21, %27 : vector<128x32xf32>
    %29 = vector.extract_strided_slice %24 {offsets = [128, 0], sizes = [128, 32], strides = [1, 1]} : vector<640x32xbf16> to vector<128x32xbf16>
    %c80 = arith.constant 80 : index
    %c0_26 = arith.constant 0 : index
    %30 = vector.load %arg7[%c80, %c0_26] : memref<544x32xbf16, #tpu.memory_space<vmem>>, vector<32x32xbf16>
    %cst_27 = arith.constant dense<0.000000e+00> : vector<128x32xf32>
    %31 = tpu.matmul %29, %30, %cst_27 {dimension_numbers = #tpu.dot_dimension_numbers<[1], [0], [0], [1], [0, 0, 1, 1], [], []>} : vector<128x32xbf16>, vector<32x32xbf16>, vector<128x32xf32> -> vector<128x32xf32>
    %32 = arith.addf %28, %31 : vector<128x32xf32>
    %33 = vector.extract_strided_slice %24 {offsets = [256, 0], sizes = [128, 32], strides = [1, 1]} : vector<640x32xbf16> to vector<128x32xbf16>
    %c112 = arith.constant 112 : index
    %c0_28 = arith.constant 0 : index
    %34 = vector.load %arg7[%c112, %c0_28] : memref<544x32xbf16, #tpu.memory_space<vmem>>, vector<32x32xbf16>
    %cst_29 = arith.constant dense<0.000000e+00> : vector<128x32xf32>
    %35 = tpu.matmul %33, %34, %cst_29 {dimension_numbers = #tpu.dot_dimension_numbers<[1], [0], [0], [1], [0, 0, 1, 1], [], []>} : vector<128x32xbf16>, vector<32x32xbf16>, vector<128x32xf32> -> vector<128x32xf32>
    %36 = arith.addf %32, %35 : vector<128x32xf32>
    %37 = vector.extract_strided_slice %24 {offsets = [384, 0], sizes = [128, 32], strides = [1, 1]} : vector<640x32xbf16> to vector<128x32xbf16>
    %c144 = arith.constant 144 : index
    %c0_30 = arith.constant 0 : index
    %38 = vector.load %arg7[%c144, %c0_30] : memref<544x32xbf16, #tpu.memory_space<vmem>>, vector<32x32xbf16>
    %cst_31 = arith.constant dense<0.000000e+00> : vector<128x32xf32>
    %39 = tpu.matmul %37, %38, %cst_31 {dimension_numbers = #tpu.dot_dimension_numbers<[1], [0], [0], [1], [0, 0, 1, 1], [], []>} : vector<128x32xbf16>, vector<32x32xbf16>, vector<128x32xf32> -> vector<128x32xf32>
    %40 = arith.addf %36, %39 : vector<128x32xf32>
    %41 = vector.extract_strided_slice %24 {offsets = [512, 0], sizes = [128, 32], strides = [1, 1]} : vector<640x32xbf16> to vector<128x32xbf16>
    %c176 = arith.constant 176 : index
    %c0_32 = arith.constant 0 : index
    %42 = vector.load %arg7[%c176, %c0_32] : memref<544x32xbf16, #tpu.memory_space<vmem>>, vector<32x32xbf16>
    %cst_33 = arith.constant dense<0.000000e+00> : vector<128x32xf32>
    %43 = tpu.matmul %41, %42, %cst_33 {dimension_numbers = #tpu.dot_dimension_numbers<[1], [0], [0], [1], [0, 0, 1, 1], [], []>} : vector<128x32xbf16>, vector<32x32xbf16>, vector<128x32xf32> -> vector<128x32xf32>
    %44 = arith.addf %40, %43 : vector<128x32xf32>
    %cst_34 = arith.constant 0.000000e+00 : f32
    %45 = vector.broadcast %cst_34 : f32 to vector<128x32xf32>
    %46 = arith.maximumf %44, %45 : vector<128x32xf32>
    %47 = arith.truncf %46 : vector<128x32xf32> to vector<128x32xbf16>
    %c464 = arith.constant 464 : index
    %c0_35 = arith.constant 0 : index
    %48 = vector.load %arg7[%c464, %c0_35] : memref<544x32xbf16, #tpu.memory_space<vmem>>, vector<32x32xbf16>
    %cst_36 = arith.constant dense<0.000000e+00> : vector<128x32xf32>
    %49 = tpu.matmul %47, %48, %cst_36 {dimension_numbers = #tpu.dot_dimension_numbers<[1], [0], [0], [1], [0, 0, 1, 1], [], []>} : vector<128x32xbf16>, vector<32x32xbf16>, vector<128x32xf32> -> vector<128x32xf32>
    %50 = arith.addf %16, %49 : vector<128x32xf32>
    %c400 = arith.constant 400 : index
    %c0_37 = arith.constant 0 : index
    %51 = vector.load %arg7[%c400, %c0_37] : memref<544x32xbf16, #tpu.memory_space<vmem>>, vector<16x32xbf16>
    %cst_38 = arith.constant dense<0.000000e+00> : vector<128x32xf32>
    %52 = tpu.matmul %9, %51, %cst_38 {dimension_numbers = #tpu.dot_dimension_numbers<[1], [0], [0], [1], [0, 0, 1, 1], [], []>} : vector<128x16xbf16>, vector<16x32xbf16>, vector<128x32xf32> -> vector<128x32xf32>
    %c416 = arith.constant 416 : index
    %c0_39 = arith.constant 0 : index
    %53 = vector.load %arg7[%c416, %c0_39] : memref<544x32xbf16, #tpu.memory_space<vmem>>, vector<16x32xbf16>
    %cst_40 = arith.constant dense<0.000000e+00> : vector<128x32xf32>
    %54 = tpu.matmul %11, %53, %cst_40 {dimension_numbers = #tpu.dot_dimension_numbers<[1], [0], [0], [1], [0, 0, 1, 1], [], []>} : vector<128x16xbf16>, vector<16x32xbf16>, vector<128x32xf32> -> vector<128x32xf32>
    %55 = arith.addf %52, %54 : vector<128x32xf32>
    %56 = arith.truncf %46 : vector<128x32xf32> to vector<128x32xbf16>
    %cst_41 = arith.constant dense<0.000000e+00> : vector<640x32xf32>
    %57 = tpu.matmul %13, %56, %cst_41 {dimension_numbers = #tpu.dot_dimension_numbers<[1], [0], [0], [1], [0, 0, 1, 1], [], []>} : vector<640x128xbf16>, vector<128x32xbf16>, vector<640x32xf32> -> vector<640x32xf32>
    %58 = arith.truncf %57 : vector<640x32xf32> to vector<640x32xbf16>
    %59 = vector.extract_strided_slice %58 {offsets = [0, 0], sizes = [128, 32], strides = [1, 1]} : vector<640x32xbf16> to vector<128x32xbf16>
    %c240 = arith.constant 240 : index
    %c0_42 = arith.constant 0 : index
    %60 = vector.load %arg7[%c240, %c0_42] : memref<544x32xbf16, #tpu.memory_space<vmem>>, vector<32x32xbf16>
    %cst_43 = arith.constant dense<0.000000e+00> : vector<128x32xf32>
    %61 = tpu.matmul %59, %60, %cst_43 {dimension_numbers = #tpu.dot_dimension_numbers<[1], [0], [0], [1], [0, 0, 1, 1], [], []>} : vector<128x32xbf16>, vector<32x32xbf16>, vector<128x32xf32> -> vector<128x32xf32>
    %62 = arith.addf %55, %61 : vector<128x32xf32>
    %63 = vector.extract_strided_slice %58 {offsets = [128, 0], sizes = [128, 32], strides = [1, 1]} : vector<640x32xbf16> to vector<128x32xbf16>
    %c272 = arith.constant 272 : index
    %c0_44 = arith.constant 0 : index
    %64 = vector.load %arg7[%c272, %c0_44] : memref<544x32xbf16, #tpu.memory_space<vmem>>, vector<32x32xbf16>
    %cst_45 = arith.constant dense<0.000000e+00> : vector<128x32xf32>
    %65 = tpu.matmul %63, %64, %cst_45 {dimension_numbers = #tpu.dot_dimension_numbers<[1], [0], [0], [1], [0, 0, 1, 1], [], []>} : vector<128x32xbf16>, vector<32x32xbf16>, vector<128x32xf32> -> vector<128x32xf32>
    %66 = arith.addf %62, %65 : vector<128x32xf32>
    %67 = vector.extract_strided_slice %58 {offsets = [256, 0], sizes = [128, 32], strides = [1, 1]} : vector<640x32xbf16> to vector<128x32xbf16>
    %c304 = arith.constant 304 : index
    %c0_46 = arith.constant 0 : index
    %68 = vector.load %arg7[%c304, %c0_46] : memref<544x32xbf16, #tpu.memory_space<vmem>>, vector<32x32xbf16>
    %cst_47 = arith.constant dense<0.000000e+00> : vector<128x32xf32>
    %69 = tpu.matmul %67, %68, %cst_47 {dimension_numbers = #tpu.dot_dimension_numbers<[1], [0], [0], [1], [0, 0, 1, 1], [], []>} : vector<128x32xbf16>, vector<32x32xbf16>, vector<128x32xf32> -> vector<128x32xf32>
    %70 = arith.addf %66, %69 : vector<128x32xf32>
    %71 = vector.extract_strided_slice %58 {offsets = [384, 0], sizes = [128, 32], strides = [1, 1]} : vector<640x32xbf16> to vector<128x32xbf16>
    %c336 = arith.constant 336 : index
    %c0_48 = arith.constant 0 : index
    %72 = vector.load %arg7[%c336, %c0_48] : memref<544x32xbf16, #tpu.memory_space<vmem>>, vector<32x32xbf16>
    %cst_49 = arith.constant dense<0.000000e+00> : vector<128x32xf32>
    %73 = tpu.matmul %71, %72, %cst_49 {dimension_numbers = #tpu.dot_dimension_numbers<[1], [0], [0], [1], [0, 0, 1, 1], [], []>} : vector<128x32xbf16>, vector<32x32xbf16>, vector<128x32xf32> -> vector<128x32xf32>
    %74 = arith.addf %70, %73 : vector<128x32xf32>
    %75 = vector.extract_strided_slice %58 {offsets = [512, 0], sizes = [128, 32], strides = [1, 1]} : vector<640x32xbf16> to vector<128x32xbf16>
    %c368 = arith.constant 368 : index
    %c0_50 = arith.constant 0 : index
    %76 = vector.load %arg7[%c368, %c0_50] : memref<544x32xbf16, #tpu.memory_space<vmem>>, vector<32x32xbf16>
    %cst_51 = arith.constant dense<0.000000e+00> : vector<128x32xf32>
    %77 = tpu.matmul %75, %76, %cst_51 {dimension_numbers = #tpu.dot_dimension_numbers<[1], [0], [0], [1], [0, 0, 1, 1], [], []>} : vector<128x32xbf16>, vector<32x32xbf16>, vector<128x32xf32> -> vector<128x32xf32>
    %78 = arith.addf %74, %77 : vector<128x32xf32>
    %cst_52 = arith.constant 0.000000e+00 : f32
    %79 = vector.broadcast %cst_52 : f32 to vector<128x32xf32>
    %80 = arith.maximumf %78, %79 : vector<128x32xf32>
    %81 = arith.truncf %80 : vector<128x32xf32> to vector<128x32xbf16>
    %c496 = arith.constant 496 : index
    %c0_53 = arith.constant 0 : index
    %82 = vector.load %arg7[%c496, %c0_53] : memref<544x32xbf16, #tpu.memory_space<vmem>>, vector<32x32xbf16>
    %cst_54 = arith.constant dense<0.000000e+00> : vector<128x32xf32>
    %83 = tpu.matmul %81, %82, %cst_54 {dimension_numbers = #tpu.dot_dimension_numbers<[1], [0], [0], [1], [0, 0, 1, 1], [], []>} : vector<128x32xbf16>, vector<32x32xbf16>, vector<128x32xf32> -> vector<128x32xf32>
    %84 = arith.addf %50, %83 : vector<128x32xf32>
    %c528 = arith.constant 528 : index
    %c0_55 = arith.constant 0 : index
    %85 = vector.load %arg7[%c528, %c0_55] : memref<544x32xbf16, #tpu.memory_space<vmem>>, vector<1x32xbf16>
    %86 = arith.extf %85 : vector<1x32xbf16> to vector<1x32xf32>
    %87 = vector.broadcast %86 : vector<1x32xf32> to vector<128x32xf32>
    %88 = arith.addf %84, %87 : vector<128x32xf32>
    %c0_56 = arith.constant 0 : index
    %c0_57 = arith.constant 0 : index
    %c0_58 = arith.constant 0 : index
    %89 = vector.load %arg6[%c0_56, %c0_57, %c0_58] : memref<1x8x128xbf16, #tpu.memory_space<vmem>>, vector<1x8x128xbf16>
    %90 = vector.shape_cast %89 : vector<1x8x128xbf16> to vector<8x128xbf16>
    %91 = arith.truncf %88 : vector<128x32xf32> to vector<128x32xbf16>
    %cst_59 = arith.constant dense<0.000000e+00> : vector<8x32xf32>
    %92 = tpu.matmul %90, %91, %cst_59 {dimension_numbers = #tpu.dot_dimension_numbers<[1], [0], [0], [1], [0, 0, 1, 1], [], []>} : vector<8x128xbf16>, vector<128x32xbf16>, vector<8x32xf32> -> vector<8x32xf32>
    %c0_60 = arith.constant 0 : index
    %c0_61 = arith.constant 0 : index
    %c0_62 = arith.constant 0 : index
    %93 = vector.load %arg8[%c0_60, %c0_61, %c0_62] : memref<1x8x32xf32, #tpu.memory_space<vmem>>, vector<1x8x32xf32>
    %94 = vector.shape_cast %93 : vector<1x8x32xf32> to vector<8x32xf32>
    %95 = vector.shape_cast %92 : vector<8x32xf32> to vector<1x8x32xf32>
    tpu.vector_store %arg8[%c0_60, %c0_61, %c0_62], %95 {strides = array<i32>} : memref<1x8x32xf32, #tpu.memory_space<vmem>>, vector<1x8x32xf32>,
    return
  }
  func.func @transform_0(%arg0: i32) -> (i32, i32, i32) {
    %c0_i32 = arith.constant 0 : i32
    %c0_i32_0 = arith.constant 0 : i32
    %c0_i32_1 = arith.constant 0 : i32
    return %arg0, %c0_i32, %c0_i32_0 : i32, i32, i32
  }
  func.func @transform_1(%arg0: i32) -> (i32, i32, i32) {
    %c0_i32 = arith.constant 0 : i32
    %c0_i32_0 = arith.constant 0 : i32
    %c0_i32_1 = arith.constant 0 : i32
    return %arg0, %c0_i32, %c0_i32_0 : i32, i32, i32
  }
  func.func @transform_2(%arg0: i32) -> (i32, i32, i32) {
    %c0_i32 = arith.constant 0 : i32
    %c0_i32_0 = arith.constant 0 : i32
    %c0_i32_1 = arith.constant 0 : i32
    return %arg0, %c0_i32, %c0_i32_0 : i32, i32, i32
  }
  func.func @transform_3(%arg0: i32) -> (i32, i32, i32) {
    %c0_i32 = arith.constant 0 : i32
    %c0_i32_0 = arith.constant 0 : i32
    %c0_i32_1 = arith.constant 0 : i32
    return %arg0, %c0_i32, %c0_i32_0 : i32, i32, i32
  }
  func.func @transform_4(%arg0: i32) -> (i32, i32, i32) {
    %c0_i32 = arith.constant 0 : i32
    %c0_i32_0 = arith.constant 0 : i32
    %c0_i32_1 = arith.constant 0 : i32
    return %arg0, %c0_i32, %c0_i32_0 : i32, i32, i32
  }
  func.func @transform_5(%arg0: i32) -> (i32, i32, i32) {
    %c0_i32 = arith.constant 0 : i32
    %c0_i32_0 = arith.constant 0 : i32
    %c0_i32_1 = arith.constant 0 : i32
    return %arg0, %c0_i32, %c0_i32_0 : i32, i32, i32
  }
  func.func @transform_6(%arg0: i32) -> (i32, i32) {
    %c0_i32 = arith.constant 0 : i32
    %c0_i32_0 = arith.constant 0 : i32
    %c0_i32_1 = arith.constant 0 : i32
    return %c0_i32, %c0_i32_0 : i32, i32
  }
  func.func @transform_7(%arg0: i32) -> (i32, i32, i32) {
    %c0_i32 = arith.constant 0 : i32
    %c0_i32_0 = arith.constant 0 : i32
    %c0_i32_1 = arith.constant 0 : i32
    return %arg0, %c0_i32, %c0_i32_0 : i32, i32, i32
  }
}

</mosaic_0001>

<bundles_post_ra>
// kernel: gcne_model_forward.1
= control target key start
LH: loop header
LB: loop body
LE: loop exit
PB: predicated region body
PF: predicated region fallthrough
CT: control target
= control target key end

     0   :  { %12 = vsyncpa [#allocation3], 0  ;;  %s7118_s0 = inlined_call_operand.vmem [shape: bf16[2,128,48], index: 0, kind: input, shape index: {}]   ;;  %s7119_s1 = inlined_call_operand.vmem [shape: bf16[2,640,128], index: 1, kind: input, shape index: {}]   ;;  %s7120_s2 = inlined_call_operand.vmem [shape: bf16[2,128,16], index: 2, kind: input, shape index: {}]   ;;  %s7121_s3 = inlined_call_operand.vmem [shape: bf16[2,128,128], index: 3, kind: input, shape index: {}]   ;;  %s7122_s4 = inlined_call_operand.vmem [shape: bf16[2,128,16], index: 4, kind: input, shape index: {}]   ;;  %s7123_s5 = inlined_call_operand.vmem [shape: bf16[2,8,128], index: 5, kind: input, shape index: {}]   ;;  %s7124_s6 = inlined_call_operand.vmem [shape: bf16[544,32], index: 6, kind: input, shape index: {}]   ;;  %s7125_s7 = inlined_call_operand.hbm [shape: f32[2,8,32], index: 7, kind: output, shape index: {}]  }
   0x1   :  { %14 = vsyncpa [#allocation3 + $0x1], 0  ;;  %s6128_s24 = smov 0   ;;  %s6130_s25 = smov 0  }
   0x2   :  { %s6132_s26 = smov 0   ;;  %s6134_s27 = smov 0  }
   0x3 LB: > { %s6149_s28 = sadd.s32 4294967295, %s6083_s27   ;;  %s4660_s29 = sadd.s32 4294967294, %s6083_s27   ;;  %s6083_s27 = sphi %s6134_s27, %s7193_s27   ;;  %s6079_s26 = sphi %s6132_s26, %s7192_s26   ;;  %s6075_s25 = sphi %s6130_s25, %s7191_s25   ;;  %s6071_s24 = sphi %s6128_s24, %s7190_s24  }
   0x4   : > { %s6153_s30 = sadd.s32 1, %s6083_s27   ;;  %s204_s8 = sadd.s32 1, %s6079_s26 }
   0x5   : > { %s201_s9 = ssub.s32 %s6083_s27, %s6153_s30  ;;  %p214_p0 = scmp.ne.s32.totalorder %s6079_s26, %s6075_s25 }
   0x6   : > { %p202_p1 = scmp.eq.s32.totalorder %s201_s9, 0  ;;  %p215_p2 = scmp.eq.s32.totalorder %s6149_s28, 1 }
   0x7   : > { %p220_p3 = scmp.ne.s32.totalorder %s6075_s25, %s6071_s24  ;;  %p221_p4 = scmp.eq.s32.totalorder %s4660_s29, 1 }
   0x8   : > { %s6164_s10 = scalar_select %p202_p1, %s6079_s26, %s204_s8  }
   0x9   : > { %p6166_p5 = por %p215_p2, %p214_p0  ;;  %p6170_p6 = por %p221_p4, %p220_p3 }
   0xa   : > { %p4663_p7 = scmp.ge.s32.totalorder %s6083_s27, 1  ;;  %p289_p8 = scmp.lt.s32.totalorder %s6083_s27, 3 }
   0xc   : > { %p290_p9 = pnand %p4663_p7, %p289_p8 }
   0xe   : > { %293 = sbr.rel (%p290_p9) target bundleno = 1890 (0x762), region = 48 }
  0x13   : > { %v5870_v0 = vld [vmem:[%s7124_s6 + $0x10] sm:$0xff]   ;;  %p345_p10 = scmp.lt.s32.totalorder %s6149_s28, 1  ;;  %v5871_v1 = vld [vmem:[%s7124_s6 + $0x8] sm:$0xff]   ;;  %v5873_v2 = vld [vmem:[%s7124_s6] sm:$0xff]   ;;  %vm455_vm0 = vcmask 392192   ;;  %vm968_vm1 = vcmask 130048  }
  0x14   : > { %5230 = vmatprep.subr.bf16.mxu0 %v5870_v0  ;;  %v5897_v4 = vld [vmem:[%s7124_s6 + $0x70] sm:$0xff]   ;;  %v5901_v31 = vld [vmem:[%s7124_s6 + $0x68] sm:$0xff]   ;;  %vm1866_vm2 = vcmask 261120   ;;  %vm6086_vm3 = vmmov 0   ;;  %s342_s16 = sand.u32 1, %s6075_s25  }
  0x15   : > { %s6184_s17 = scalar_select %p345_p10, %s6149_s28, 1  ;;  %5231 = vmatpush3.bf16.msra.mxu0 %v5870_v0 }
  0x16   : > { %5232 = vmatprep.subr.bf16.mxu0 %v5871_v1  ;;  %s4528_s8 = scalar_lea.sflag [#allocation3], %s342_s16 }
  0x17   : > { %s6187_s18 = sshll.u32 %s6184_s17, 6  ;;  %s5828_s20 = smul.u32 320, %s6184_s17 }
  0x18   : > { %s6196_s23 = scalar_lea.vmem %s7122_s4, %s6187_s18  ;;  %s6202_s9 = scalar_lea.vmem %s7118_s0, %s6187_s18 }
  0x19   : > { %v5872_v3 = vld [vmem:[%s6196_s23 + $0x38] sm:$0xff]   ;;  %5233 = vmatpush3.bf16.msra.mxu0 %v5871_v1  ;;  %v5874_v5 = vld [vmem:[%s6196_s23 + $0x30] sm:$0xff]   ;;  %v5875_v6 = vld [vmem:[%s6202_s9] sm:$0xff]   ;;  %s6224_s19 = scalar_lea.vmem %s7121_s3, %s6187_s18  ;;  %s6237_s29 = scalar_lea.vmem %s7119_s1, %s5828_s20 }
  0x1a   : > { %5252 = vmatprep.subr.bf16.mxu1 %v5872_v3  ;;  %5234 = vmatprep.subr.bf16.mxu0 %v5873_v2  ;;  %v5876_v7 = vld [vmem:[%s6202_s9 + $0x8] sm:$0xff]   ;;  %v5879_v9 = vld [vmem:[%s6202_s9 + $0x10] sm:$0xff]   ;;  %v5878_v10 = vld [vmem:[%s6196_s23 + $0x20] sm:$0xff]  }
  0x1b   : > { %5253 = vmatpush3.bf16.msra.mxu1 %v5872_v3  ;;  %5236 = vmatprep.mubr.msk.bf16.mxu0 %vm455_vm0, %v5875_v6  ;;  %v5877_v8 = vld [vmem:[%s6196_s23 + $0x28] sm:$0xff]   ;;  %v5880_v11 = vld [vmem:[%s6202_s9 + $0x18] sm:$0xff]   ;;  %v5883_v13 = vld [vmem:[%s6202_s9 + $0x20] sm:$0xff]  }
  0x1c   : > { %5254 = vmatprep.subr.bf16.mxu1 %v5874_v5  ;;  %v5881_v12 = vld [vmem:[%s6196_s23 + $0x18] sm:$0xff]   ;;  %v5882_v14 = vld [vmem:[%s6196_s23 + $0x10] sm:$0xff]   ;;  %v5889_v15 = vld [vmem:[%s6224_s19] sm:$0xff]  }
  0x1d   : > { %5235 = vmatpush3.bf16.msra.mxu0 %v5873_v2  ;;  %5268 = vmatprep.mubr.bf16.mxu1 %v5889_v15  ;;  %v5884_v16 = vld [vmem:[%s6202_s9 + $0x28] sm:$0xff]   ;;  %v5887_v18 = vld [vmem:[%s6202_s9 + $0x30] sm:$0xff]   ;;  %v5886_v19 = vld [vmem:[%s6196_s23] sm:$0xff]  }
  0x1e   : > { %5284 = vmatprep.subr.bf16.mxu0 %v5897_v4  ;;  %v5885_v17 = vld [vmem:[%s6196_s23 + $0x8] sm:$0xff]   ;;  %v5888_v20 = vld [vmem:[%s6202_s9 + $0x38] sm:$0xff]   ;;  %v5891_v22 = vld [vmem:[%s6224_s19 + $0x10] sm:$0xff]   ;;  %s6255_s9 = scalar_lea.vmem %s7120_s2, %s6187_s18 }
  0x1f   : > { %5255 = vmatpush3.bf16.msra.mxu1 %v5874_v5  ;;  %v5890_v21 = vld [vmem:[%s6224_s19 + $0x8] sm:$0xff]   ;;  %v5892_v23 = vld [vmem:[%s6224_s19 + $0x18] sm:$0xff]   ;;  %v5893_v24 = vld [vmem:[%s6224_s19 + $0x20] sm:$0xff]  }
  0x20   : > { %5237 = vmatmul.mubr.msk.bf16.vlgmr.msra.gmra.mxu0 %vm455_vm0, %v5876_v7  ;;  %5256 = vmatprep.subr.bf16.mxu1 %v5877_v8  ;;  %v5894_v25 = vld [vmem:[%s6224_s19 + $0x28] sm:$0xff]   ;;  %v5895_v26 = vld [vmem:[%s6224_s19 + $0x30] sm:$0xff]   ;;  %v5896_v27 = vld [vmem:[%s6224_s19 + $0x38] sm:$0xff]   ;;  %s4664_s19 = sshll.u32 %s342_s16, 3 }
  0x21   : > { %5240 = vmatprep.mubr.msk.bf16.mxu0 %vm455_vm0, %v5879_v9  ;;  %5285 = vmatpush3.bf16.msra.mxu0 %v5897_v4  ;;  %v5898_v28 = vld [vmem:[%s6255_s9] sm:$0xff]   ;;  %v5899_v29 = vld [vmem:[%s6255_s9 + $0x8] sm:$0xff]   ;;  %v5900_v30 = vld [vmem:[%s6255_s9 + $0x10] sm:$0xff]  }
  0x22   : > { %v5902_v32 = vld [vmem:[%s6255_s9 + $0x18] sm:$0xff]   ;;  %v5903_v33 = vld [vmem:[%s6255_s9 + $0x20] sm:$0xff]   ;;  %v5904_v34 = vld [vmem:[%s6255_s9 + $0x28] sm:$0xff]  }
  0x23   : > { %5257 = vmatpush3.bf16.msra.mxu1 %v5877_v8  ;;  %v5905_v35 = vld [vmem:[%s6255_s9 + $0x30] sm:$0xff]   ;;  %v5906_v36 = vld [vmem:[%s6255_s9 + $0x38] sm:$0xff]   ;;  %v5907_v37 = vld [vmem:[%s6237_s29] sm:$0xff]  }
  0x24   : > { %5258 = vmatprep.subr.bf16.mxu1 %v5878_v10 }
  0x27   : > { %5259 = vmatpush3.bf16.msra.mxu1 %v5878_v10 }
  0x28   : > { %5241 = vmatmul.mubr.msk.bf16.gmra.mxu0 %vm455_vm0, %v5880_v11  ;;  %5260 = vmatprep.subr.bf16.mxu1 %v5881_v12 }
  0x29   : > { %5244 = vmatprep.mubr.msk.bf16.mxu0 %vm455_vm0, %v5883_v13 }
  0x2b   : > { %5261 = vmatpush3.bf16.msra.mxu1 %v5881_v12 }
  0x2c   : > { %5262 = vmatprep.subr.bf16.mxu1 %v5882_v14 }
  0x2f   : > { %5263 = vmatpush3.bf16.msra.mxu1 %v5882_v14 }
  0x30   : > { %5245 = vmatmul.mubr.msk.bf16.gmra.mxu0 %vm455_vm0, %v5884_v16  ;;  %5264 = vmatprep.subr.bf16.mxu1 %v5885_v17 }
  0x31   : > { %5248 = vmatprep.mubr.msk.bf16.mxu0 %vm455_vm0, %v5887_v18 }
  0x33   : > { %5265 = vmatpush3.bf16.msra.mxu1 %v5885_v17 }
  0x34   : > { %5266 = vmatprep.subr.bf16.mxu1 %v5886_v19 }
  0x37   : > { %5267 = vmatpush3.bf16.msra.mxu1 %v5886_v19 }
  0x38   : > { %5249 = vmatmul.mubr.msk.bf16.gmra.mxu0 %vm455_vm0, %v5888_v20  ;;  %5302 = vmatprep.subr.bf16.mxu1 %v5901_v31 }
  0x39   : > { %5286 = vmatprep.mubr.msk.bf16.mxu0 %vm968_vm1, %v5898_v28  ;;  %v5914_v28 = vld [vmem:[%s6237_s29 + $0x38] sm:$0xff]  }
  0x3a   : > { %5269 = vmatmul.mubr.bf16.vlgmr.msra.gmra.mxu1 %v5890_v21 }
  0x3b   : > { %5272 = vmatprep.mubr.bf16.mxu1 %v5891_v22  ;;  %5303 = vmatpush3.bf16.msra.mxu1 %v5901_v31  ;;  %v5908_v22 = vld [vmem:[%s6237_s29 + $0x8] sm:$0xff]   ;;  %v5917_v31 = vld [vmem:[%s6237_s29 + $0x50] sm:$0xff]  }
  0x40   : > { %5287 = vmatmul.mubr.msk.bf16.vlgmr.msra.gmra.mxu0 %vm968_vm1, %v5899_v29  ;;  %v5915_v29 = vld [vmem:[%s6237_s29 + $0x40] sm:$0xff]  }
  0x41   : > { %5290 = vmatprep.mubr.msk.bf16.mxu0 %vm968_vm1, %v5900_v30  ;;  %v5916_v30 = vld [vmem:[%s6237_s29 + $0x48] sm:$0xff]  }
  0x42   : > { %5273 = vmatmul.mubr.bf16.gmra.mxu1 %v5892_v23  ;;  %v5909_v23 = vld [vmem:[%s6237_s29 + $0x10] sm:$0xff]  }
  0x43   : > { %5276 = vmatprep.mubr.bf16.mxu1 %v5893_v24  ;;  %v5910_v24 = vld [vmem:[%s6237_s29 + $0x18] sm:$0xff]  }
  0x48   : > { %5291 = vmatmul.mubr.msk.bf16.gmra.mxu0 %vm968_vm1, %v5902_v32  ;;  %v5918_v32 = vld [vmem:[%s6237_s29 + $0x58] sm:$0xff]  }
  0x49   : > { %5294 = vmatprep.mubr.msk.bf16.mxu0 %vm968_vm1, %v5903_v33  ;;  %v5919_v33 = vld [vmem:[%s6237_s29 + $0x60] sm:$0xff]  }
  0x4a   : > { %5277 = vmatmul.mubr.bf16.gmra.mxu1 %v5894_v25  ;;  %v5911_v25 = vld [vmem:[%s6237_s29 + $0x20] sm:$0xff]  }
  0x4b   : > { %5280 = vmatprep.mubr.bf16.mxu1 %v5895_v26  ;;  %v5912_v26 = vld [vmem:[%s6237_s29 + $0x28] sm:$0xff]  }
  0x50   : > { %5295 = vmatmul.mubr.msk.bf16.gmra.mxu0 %vm968_vm1, %v5904_v34  ;;  %v5947_v34 = vld [vmem:[%s7124_s6 + $0x20] sm:$0xff]  }
  0x51   : > { %5298 = vmatprep.mubr.msk.bf16.mxu0 %vm968_vm1, %v5905_v35  ;;  %v5920_v35 = vld [vmem:[%s6237_s29 + $0x68] sm:$0xff]   ;;  %5416 = vmatprep.subr.bf16.mxu1 %v5947_v34 }
  0x52   : > { %5281 = vmatmul.mubr.bf16.gmra.mxu1 %v5896_v27  ;;  %v5913_v27 = vld [vmem:[%s6237_s29 + $0x30] sm:$0xff]  }
  0x58   : > { %5299 = vmatmul.mubr.msk.bf16.gmra.mxu0 %vm968_vm1, %v5906_v36  ;;  %v5921_v36 = vld [vmem:[%s6237_s29 + $0x70] sm:$0xff]  }
  0x59   : > { %5336 = vmatprep.mubr.bf16.mxu0 %v5907_v37  ;;  %v5922_v37 = vld [vmem:[%s6237_s29 + $0x78] sm:$0xff]  }
  0xe0   : > { %v5238_v38 = vpop.f32.mrf.mxu0 }
  0xe2   : > { %v514_v39 = vpop.f32.mrf.mxu0 }
  0xe4   : > { %v5239_v40 = vpop.f32.mrf.mxu0 }
  0xe5   : > { %v6320_v15 = vpack.c.bf16 %v5239_v40, %v5238_v38  ;;  %v5923_v38 = vld [vmem:[%s6237_s29 + $0x80] sm:$0xff]   ;;  %v5924_v40 = vld [vmem:[%s6237_s29 + $0x88] sm:$0xff]  }
  0xe6   : > { %v517_v41 = vpop.f32.mrf.mxu0 }
  0xe7   : > { %v6328_v18 = vpack.c.bf16 %v517_v41, %v514_v39  ;;  %v5948_v39 = vld [vmem:[%s7124_s6 + $0x18] sm:$0xff]   ;;  %v5925_v41 = vld [vmem:[%s6237_s29 + $0x90] sm:$0xff]  }
  0xe8   : > { %v5242_v42 = vpop.f32.mrf.mxu0 }
  0xea   : > { %v530_v43 = vpop.f32.mrf.mxu0 }
  0xec   : > { %v5243_v44 = vpop.f32.mrf.mxu0 }
  0xed   : > { %v6304_v7 = vpack.c.bf16 %v5243_v44, %v5242_v42  ;;  %v5926_v42 = vld [vmem:[%s6237_s29 + $0x98] sm:$0xff]   ;;  %v6370_v44 = vld [vmem:[%s7124_s6 + $0x30] sm:$0xff]  }
  0xee   : > { %v533_v45 = vpop.f32.mrf.mxu0 }
  0xef   : > { %v6312_v10 = vpack.c.bf16 %v533_v45, %v530_v43  ;;  %v5927_v43 = vld [vmem:[%s6237_s29 + $0xa0] sm:$0xff]   ;;  %v5928_v45 = vld [vmem:[%s6237_s29 + $0xa8] sm:$0xff]  }
  0xf0   : > { %v5246_v46 = vpop.f32.mrf.mxu0 }
  0xf2   : > { %v546_v47 = vpop.f32.mrf.mxu0 }
  0xf4   : > { %v5247_v48 = vpop.f32.mrf.mxu0 }
  0xf5   : > { %v6288_v63 = vpack.c.bf16 %v5247_v48, %v5246_v46  ;;  %v5929_v46 = vld [vmem:[%s6237_s29 + $0xb0] sm:$0xff]   ;;  %v5931_v48 = vld [vmem:[%s6237_s29 + $0xc0] sm:$0xff]  }
  0xf6   : > { %v549_v49 = vpop.f32.mrf.mxu0 }
  0xf7   : > { %v6296_v2 = vpack.c.bf16 %v549_v49, %v546_v47  ;;  %v5930_v47 = vld [vmem:[%s6237_s29 + $0xb8] sm:$0xff]   ;;  %v5932_v49 = vld [vmem:[%s6237_s29 + $0xc8] sm:$0xff]  }
  0xf8   : > { %v5250_v50 = vpop.f32.mrf.mxu0 }
  0xfa   : > { %v562_v51 = vpop.f32.mrf.mxu0  ;;  %v5270_v52 = vpop.f32.mrf.mxu1 }
  0xfc   : > { %v5251_v53 = vpop.f32.mrf.mxu0  ;;  %v739_v54 = vpop.f32.mrf.mxu1 }
  0xfd   : > { %v6277_v55 = vpack.c.bf16 %v5251_v53, %v5250_v50  ;;  %v5933_v50 = vld [vmem:[%s6237_s29 + $0xd0] sm:$0xff]   ;;  %v5936_v53 = vld [vmem:[%s6237_s29 + $0xe8] sm:$0xff]  }
  0xfe   : > { %v565_v56 = vpop.f32.mrf.mxu0  ;;  %v5271_v57 = vpop.f32.mrf.mxu1 }
  0xff   : > { %v6279_v58 = vpack.c.bf16 %v565_v56, %v562_v51  ;;  %5320 = vmatprep.subr.bf16.mxu0 %v6277_v55  ;;  %v6282_v59 = vpack.c.bf16 %v5271_v57, %v5270_v52  ;;  %v5934_v51 = vld [vmem:[%s6237_s29 + $0xd8] sm:$0xff]   ;;  %v5935_v52 = vld [vmem:[%s6237_s29 + $0xe0] sm:$0xff]  }
 0x100   : > { %v742_v60 = vpop.f32.mrf.mxu1  ;;  %5321 = vmatpush3.bf16.msra.mxu0 %v6277_v55  ;;  %v5938_v56 = vld [vmem:[%s6237_s29 + $0xf8] sm:$0xff]   ;;  %v5939_v57 = vld [vmem:[%s6237_s29 + $0x100] sm:$0xff]  }
 0x101   : > { %v6285_v61 = vpack.c.bf16 %v742_v60, %v739_v54  ;;  %5322 = vmatprep.subr.bf16.mxu0 %v6279_v58  ;;  %v5937_v54 = vld [vmem:[%s6237_s29 + $0xf0] sm:$0xff]   ;;  %v5940_v60 = vld [vmem:[%s6237_s29 + $0x108] sm:$0xff]  }
 0x102   : > { %v5274_v62 = vpop.f32.mrf.mxu1 }
 0x103   : > { %5304 = vmatprep.mubr.msk.bf16.mxu1 %vm968_vm1, %v6285_v61 }
 0x104   : > { %v755_v0 = vpop.f32.mrf.mxu1  ;;  %5305 = vmatmul.mubr.msk.bf16.vlgmr.msra.gmra.mxu1 %vm968_vm1, %v6282_v59  ;;  %5323 = vmatpush3.bf16.msra.mxu0 %v6279_v58 }
 0x105   : > { %5324 = vmatprep.subr.bf16.mxu0 %v6288_v63  ;;  %5417 = vmatpush3.bf16.msra.mxu1 %v5947_v34 }
 0x106   : > { %v5275_v1 = vpop.f32.mrf.mxu1  ;;  %5418 = vmatprep.subr.bf16.mxu1 %v5948_v39 }
 0x107   : > { %v6298_v3 = vpack.c.bf16 %v5275_v1, %v5274_v62  ;;  %v5941_v62 = vld [vmem:[%s6237_s29 + $0x110] sm:$0xff]   ;;  %v5942_v1 = vld [vmem:[%s6237_s29 + $0x118] sm:$0xff]  }
 0x108   : > { %v758_v4 = vpop.f32.mrf.mxu1  ;;  %5325 = vmatpush3.bf16.msra.mxu0 %v6288_v63 }
 0x109   : > { %v6301_v5 = vpack.c.bf16 %v758_v4, %v755_v0  ;;  %5326 = vmatprep.subr.bf16.mxu0 %v6296_v2  ;;  %5419 = vmatpush3.bf16.msra.mxu1 %v5948_v39  ;;  %v6387_v0 = vpop.f32.mrf.mxu0  ;;  %v5943_v4 = vld [vmem:[%s6237_s29 + $0x120] sm:$0xff]   ;;  %v5950_v39 = vld [vmem:[%s7124_s6 + $0x28] sm:$0xff]  }
 0x10a   : > { %v5278_v6 = vpop.f32.mrf.mxu1  ;;  %5436 = vmatprep.subr.bf16.mxu1 %v6370_v44 }
 0x10b   : > { %5308 = vmatprep.mubr.msk.bf16.mxu1 %vm968_vm1, %v6301_v5 }
 0x10c   : > { %v771_v8 = vpop.f32.mrf.mxu1  ;;  %5309 = vmatmul.mubr.msk.bf16.gmra.mxu1 %vm968_vm1, %v6298_v3  ;;  %5327 = vmatpush3.bf16.msra.mxu0 %v6296_v2 }
 0x10d   : > { %5328 = vmatprep.subr.bf16.mxu0 %v6304_v7 }
 0x10e   : > { %v5279_v9 = vpop.f32.mrf.mxu1 }
 0x10f   : > { %v6314_v11 = vpack.c.bf16 %v5279_v9, %v5278_v6  ;;  %v6391_v6 = vpop.f32.mrf.mxu0  ;;  %v5944_v9 = vld [vmem:[%s6237_s29 + $0x128] sm:$0xff]  }
 0x110   : > { %v774_v12 = vpop.f32.mrf.mxu1  ;;  %5329 = vmatpush3.bf16.msra.mxu0 %v6304_v7 }
 0x111   : > { %v6317_v13 = vpack.c.bf16 %v774_v12, %v771_v8  ;;  %5330 = vmatprep.subr.bf16.mxu0 %v6312_v10  ;;  %v6393_v8 = vpop.f32.mrf.mxu0  ;;  %v5945_v12 = vld [vmem:[%s6237_s29 + $0x130] sm:$0xff]  }
 0x112   : > { %v5282_v14 = vpop.f32.mrf.mxu1 }
 0x113   : > { %5312 = vmatprep.mubr.msk.bf16.mxu1 %vm968_vm1, %v6317_v13 }
 0x114   : > { %v787_v16 = vpop.f32.mrf.mxu1  ;;  %5313 = vmatmul.mubr.msk.bf16.gmra.mxu1 %vm968_vm1, %v6314_v11  ;;  %5331 = vmatpush3.bf16.msra.mxu0 %v6312_v10 }
 0x115   : > { %5332 = vmatprep.subr.bf16.mxu0 %v6320_v15 }
 0x116   : > { %v5283_v17 = vpop.f32.mrf.mxu1 }
 0x117   : > { %v6330_v19 = vpack.c.bf16 %v5283_v17, %v5282_v14  ;;  %v6397_v14 = vpop.f32.mrf.mxu0  ;;  %v5946_v17 = vld [vmem:[%s6237_s29 + $0x138] sm:$0xff]  }
 0x118   : > { %v790_v20 = vpop.f32.mrf.mxu1  ;;  %5333 = vmatpush3.bf16.msra.mxu0 %v6320_v15 }
 0x119   : > { %v6333_v21 = vpack.c.bf16 %v790_v20, %v787_v16  ;;  %5334 = vmatprep.subr.bf16.mxu0 %v6328_v18  ;;  %v6399_v16 = vpop.f32.mrf.mxu0 }
 0x11b   : > { %5316 = vmatprep.mubr.msk.bf16.mxu1 %vm968_vm1, %v6333_v21  ;;  %v6402_v20 = vpop.f32.mrf.mxu0 }
 0x11c   : > { %5317 = vmatmul.mubr.msk.bf16.gmra.mxu1 %vm968_vm1, %v6330_v19  ;;  %5335 = vmatpush3.bf16.msra.mxu0 %v6328_v18 }
 0x11f   : > { %5337 = vmatmul.mubr.bf16.vlgmr.msra.gmra.mxu0 %v5908_v22  ;;  %v6404_v22 = vpop.f32.mrf.mxu0 }
 0x120   : > { %5340 = vmatprep.mubr.bf16.mxu0 %v5909_v23 }
 0x121   : > { %v6406_v23 = vpop.f32.mrf.mxu0 }
 0x127   : > { %5341 = vmatmul.mubr.bf16.gmra.mxu0 %v5910_v24  ;;  %v6408_v24 = vpop.f32.mrf.mxu0 }
 0x128   : > { %5344 = vmatprep.mubr.bf16.mxu0 %v5911_v25 }
 0x129   : > { %v6410_v25 = vpop.f32.mrf.mxu0 }
 0x12f   : > { %5345 = vmatmul.mubr.bf16.gmra.mxu0 %v5912_v26  ;;  %v6412_v26 = vpop.f32.mrf.mxu0 }
 0x130   : > { %5348 = vmatprep.mubr.bf16.mxu0 %v5913_v27 }
 0x131   : > { %v6414_v27 = vpop.f32.mrf.mxu0 }
 0x137   : > { %5349 = vmatmul.mubr.bf16.gmra.mxu0 %v5914_v28  ;;  %v6416_v28 = vpop.f32.mrf.mxu0 }
 0x138   : > { %5352 = vmatprep.mubr.bf16.mxu0 %v5915_v29 }
 0x139   : > { %v6418_v29 = vpop.f32.mrf.mxu0 }
 0x13f   : > { %5353 = vmatmul.mubr.bf16.gmra.mxu0 %v5916_v30  ;;  %v6420_v30 = vpop.f32.mrf.mxu0 }
 0x140   : > { %5356 = vmatprep.mubr.bf16.mxu0 %v5917_v31 }
 0x141   : > { %v6422_v31 = vpop.f32.mrf.mxu0 }
 0x147   : > { %5357 = vmatmul.mubr.bf16.gmra.mxu0 %v5918_v32 }
 0x148   : > { %5360 = vmatprep.mubr.bf16.mxu0 %v5919_v33 }
 0x14f   : > { %5361 = vmatmul.mubr.bf16.gmra.mxu0 %v5920_v35 }
 0x150   : > { %5364 = vmatprep.mubr.bf16.mxu0 %v5921_v36 }
 0x157   : > { %5365 = vmatmul.mubr.bf16.gmra.mxu0 %v5922_v37 }
 0x158   : > { %5368 = vmatprep.mubr.bf16.mxu0 %v5923_v38 }
 0x15f   : > { %5369 = vmatmul.mubr.bf16.gmra.mxu0 %v5924_v40 }
 0x160   : > { %5372 = vmatprep.mubr.bf16.mxu0 %v5925_v41 }
 0x167   : > { %5373 = vmatmul.mubr.bf16.gmra.mxu0 %v5926_v42  ;;  %v5951_v42 = vld [vmem:[%s7124_s6 + $0x40] sm:$0xff]  }
 0x168   : > { %5376 = vmatprep.mubr.bf16.mxu0 %v5927_v43 }
 0x16f   : > { %5377 = vmatmul.mubr.bf16.gmra.mxu0 %v5928_v45 }
 0x170   : > { %5380 = vmatprep.mubr.bf16.mxu0 %v5929_v46 }
 0x177   : > { %5381 = vmatmul.mubr.bf16.gmra.mxu0 %v5930_v47 }
 0x178   : > { %5384 = vmatprep.mubr.bf16.mxu0 %v5931_v48 }
 0x17f   : > { %5385 = vmatmul.mubr.bf16.gmra.mxu0 %v5932_v49 }
 0x180   : > { %5388 = vmatprep.mubr.bf16.mxu0 %v5933_v50 }
 0x187   : > { %5389 = vmatmul.mubr.bf16.gmra.mxu0 %v5934_v51 }
 0x188   : > { %5392 = vmatprep.mubr.bf16.mxu0 %v5935_v52 }
 0x18f   : > { %5393 = vmatmul.mubr.bf16.gmra.mxu0 %v5936_v53 }
 0x190   : > { %5396 = vmatprep.mubr.bf16.mxu0 %v5937_v54 }
 0x197   : > { %5397 = vmatmul.mubr.bf16.gmra.mxu0 %v5938_v56 }
 0x198   : > { %5400 = vmatprep.mubr.bf16.mxu0 %v5939_v57 }
 0x19f   : > { %5401 = vmatmul.mubr.bf16.gmra.mxu0 %v5940_v60 }
 0x1a0   : > { %5404 = vmatprep.mubr.bf16.mxu0 %v5941_v62 }
 0x1a7   : > { %5405 = vmatmul.mubr.bf16.gmra.mxu0 %v5942_v1 }
 0x1a8   : > { %5408 = vmatprep.mubr.bf16.mxu0 %v5943_v4 }
 0x1af   : > { %5409 = vmatmul.mubr.bf16.gmra.mxu0 %v5944_v9 }
 0x1b0   : > { %5412 = vmatprep.mubr.bf16.mxu0 %v5945_v12 }
 0x1b7   : > { %5413 = vmatmul.mubr.bf16.gmra.mxu0 %v5946_v17 }
 0x1df   : > { %v5338_v32 = vpop.f32.mrf.mxu0 }
 0x1e1   : > { %v1491_v33 = vpop.f32.mrf.mxu0 }
 0x1e3   : > { %v5339_v34 = vpop.f32.mrf.mxu0 }
 0x1e4   : > { %v1811_v37 = vpack.c.bf16 %v5339_v34, %v5338_v32 }
 0x1e5   : > { %v1494_v35 = vpop.f32.mrf.mxu0 }
 0x1e6   : > { %v1810_v36 = vpack.c.bf16 %v1494_v35, %v1491_v33  ;;  %v5952_v33 = vld [vmem:[%s7124_s6 + $0x38] sm:$0xff]  }
 0x1e7   : > { %v5342_v38 = vpop.f32.mrf.mxu0 }
 0x1e8   : > { %5420 = vmatprep.mubr.msk.bf16.mxu1 %vm1866_vm2, %v1810_v36  ;;  %v5953_v36 = vld [vmem:[%s7124_s6 + $0x50] sm:$0xff]  }
 0x1e9   : > { %v1507_v40 = vpop.f32.mrf.mxu0  ;;  %5421 = vmatmul.mubr.msk.bf16.vlgmr.msra.gmra.mxu1 %vm1866_vm2, %v1811_v37 }
 0x1ea   : > { %5437 = vmatpush3.bf16.msra.mxu1 %v6370_v44 }
 0x1eb   : > { %v5343_v41 = vpop.f32.mrf.mxu0  ;;  %5438 = vmatprep.subr.bf16.mxu1 %v5950_v39 }
 0x1ec   : > { %v1813_v46 = vpack.c.bf16 %v5343_v41, %v5342_v38 }
 0x1ed   : > { %v1510_v43 = vpop.f32.mrf.mxu0 }
 0x1ee   : > { %v1812_v45 = vpack.c.bf16 %v1510_v43, %v1507_v40  ;;  %5439 = vmatpush3.bf16.msra.mxu1 %v5950_v39 }
 0x1ef   : > { %v5346_v47 = vpop.f32.mrf.mxu0  ;;  %5456 = vmatprep.subr.bf16.mxu1 %v5951_v42 }
 0x1f0   : > { %5424 = vmatprep.mubr.msk.bf16.mxu1 %vm1866_vm2, %v1812_v45 }
 0x1f1   : > { %v1523_v48 = vpop.f32.mrf.mxu0  ;;  %5425 = vmatmul.mubr.msk.bf16.gmra.mxu1 %vm1866_vm2, %v1813_v46 }
 0x1f3   : > { %v5347_v49 = vpop.f32.mrf.mxu0 }
 0x1f4   : > { %v1815_v51 = vpack.c.bf16 %v5347_v49, %v5346_v47 }
 0x1f5   : > { %v1526_v50 = vpop.f32.mrf.mxu0 }
 0x1f6   : > { %v1814_v44 = vpack.c.bf16 %v1526_v50, %v1523_v48 }
 0x1f7   : > { %v5350_v52 = vpop.f32.mrf.mxu0 }
 0x1f8   : > { %5428 = vmatprep.mubr.msk.bf16.mxu1 %vm1866_vm2, %v1814_v44 }
 0x1f9   : > { %v1539_v53 = vpop.f32.mrf.mxu0  ;;  %5429 = vmatmul.mubr.msk.bf16.gmra.mxu1 %vm1866_vm2, %v1815_v51 }
 0x1fb   : > { %v5351_v54 = vpop.f32.mrf.mxu0 }
 0x1fc   : > { %v1817_v60 = vpack.c.bf16 %v5351_v54, %v5350_v52 }
 0x1fd   : > { %v1542_v56 = vpop.f32.mrf.mxu0 }
 0x1fe   : > { %v1816_v57 = vpack.c.bf16 %v1542_v56, %v1539_v53 }
 0x1ff   : > { %v5354_v62 = vpop.f32.mrf.mxu0 }
 0x200   : > { %5432 = vmatprep.mubr.msk.bf16.mxu1 %vm1866_vm2, %v1816_v57 }
 0x201   : > { %v1555_v1 = vpop.f32.mrf.mxu0  ;;  %5433 = vmatmul.mubr.msk.bf16.gmra.mxu1 %vm1866_vm2, %v1817_v60 }
 0x203   : > { %v5355_v4 = vpop.f32.mrf.mxu0 }
 0x204   : > { %v1819_v17 = vpack.c.bf16 %v5355_v4, %v5354_v62  ;;  %v5954_v4 = vld [vmem:[%s7124_s6 + $0x48] sm:$0xff]  }
 0x205   : > { %v1558_v9 = vpop.f32.mrf.mxu0 }
 0x206   : > { %v1818_v12 = vpack.c.bf16 %v1558_v9, %v1555_v1 }
 0x207   : > { %v5358_v32 = vpop.f32.mrf.mxu0 }
 0x208   : > { %5440 = vmatprep.mubr.msk.bf16.mxu1 %vm1866_vm2, %v1818_v12 }
 0x209   : > { %v1571_v34 = vpop.f32.mrf.mxu0  ;;  %5441 = vmatmul.mubr.msk.bf16.vlgmr.msra.gmra.mxu1 %vm1866_vm2, %v1819_v17  ;;  %v5955_v17 = vld [vmem:[%s7124_s6 + $0x60] sm:$0xff]  }
 0x20a   : > { %5457 = vmatpush3.bf16.msra.mxu1 %v5951_v42  ;;  %v5959_v42 = vld [vmem:[%s7124_s6 + $0xf0] sm:$0xff]  }
 0x20b   : > { %v5359_v35 = vpop.f32.mrf.mxu0  ;;  %5458 = vmatprep.subr.bf16.mxu1 %v5952_v33  ;;  %5516 = vmatprep.subr.bf16.mxu0 %v5959_v42 }
 0x20c   : > { %v1821_v39 = vpack.c.bf16 %v5359_v35, %v5358_v32  ;;  %5517 = vmatpush3.bf16.msra.mxu0 %v5959_v42 }
 0x20d   : > { %v1574_v37 = vpop.f32.mrf.mxu0 }
 0x20e   : > { %v1820_v38 = vpack.c.bf16 %v1574_v37, %v1571_v34  ;;  %5459 = vmatpush3.bf16.msra.mxu1 %v5952_v33 }
 0x20f   : > { %v5362_v40 = vpop.f32.mrf.mxu0  ;;  %5476 = vmatprep.subr.bf16.mxu1 %v5953_v36 }
 0x210   : > { %5444 = vmatprep.mubr.msk.bf16.mxu1 %vm1866_vm2, %v1820_v38 }
 0x211   : > { %v1587_v41 = vpop.f32.mrf.mxu0  ;;  %5445 = vmatmul.mubr.msk.bf16.gmra.mxu1 %vm1866_vm2, %v1821_v39 }
 0x213   : > { %v5363_v43 = vpop.f32.mrf.mxu0 }
 0x214   : > { %v1823_v47 = vpack.c.bf16 %v5363_v43, %v5362_v40 }
 0x215   : > { %v1590_v45 = vpop.f32.mrf.mxu0 }
 0x216   : > { %v1822_v46 = vpack.c.bf16 %v1590_v45, %v1587_v41 }
 0x217   : > { %v5366_v48 = vpop.f32.mrf.mxu0 }
 0x218   : > { %5448 = vmatprep.mubr.msk.bf16.mxu1 %vm1866_vm2, %v1822_v46 }
 0x219   : > { %v1603_v49 = vpop.f32.mrf.mxu0  ;;  %5449 = vmatmul.mubr.msk.bf16.gmra.mxu1 %vm1866_vm2, %v1823_v47 }
 0x21b   : > { %v5367_v50 = vpop.f32.mrf.mxu0 }
 0x21c   : > { %v1825_v52 = vpack.c.bf16 %v5367_v50, %v5366_v48 }
 0x21d   : > { %v1606_v44 = vpop.f32.mrf.mxu0 }
 0x21e   : > { %v1824_v51 = vpack.c.bf16 %v1606_v44, %v1603_v49 }
 0x21f   : > { %v5370_v53 = vpop.f32.mrf.mxu0 }
 0x220   : > { %5452 = vmatprep.mubr.msk.bf16.mxu1 %vm1866_vm2, %v1824_v51 }
 0x221   : > { %v1619_v54 = vpop.f32.mrf.mxu0  ;;  %5453 = vmatmul.mubr.msk.bf16.gmra.mxu1 %vm1866_vm2, %v1825_v52 }
 0x223   : > { %v5371_v56 = vpop.f32.mrf.mxu0 }
 0x224   : > { %v1827_v62 = vpack.c.bf16 %v5371_v56, %v5370_v53 }
 0x225   : > { %v1622_v57 = vpop.f32.mrf.mxu0 }
 0x226   : > { %v1826_v60 = vpack.c.bf16 %v1622_v57, %v1619_v54  ;;  %v5956_v54 = vld [vmem:[%s7124_s6 + $0x58] sm:$0xff]  }
 0x227   : > { %v5374_v1 = vpop.f32.mrf.mxu0 }
 0x228   : > { %5460 = vmatprep.mubr.msk.bf16.mxu1 %vm1866_vm2, %v1826_v60  ;;  %v5957_v60 = vld [vmem:[%s7124_s6 + $0xe0] sm:$0xff]  }
 0x229   : > { %v1635_v9 = vpop.f32.mrf.mxu0  ;;  %5461 = vmatmul.mubr.msk.bf16.vlgmr.msra.gmra.mxu1 %vm1866_vm2, %v1827_v62 }
 0x22a   : > { %5477 = vmatpush3.bf16.msra.mxu1 %v5953_v36 }
 0x22b   : > { %v5375_v12 = vpop.f32.mrf.mxu0  ;;  %5478 = vmatprep.subr.bf16.mxu1 %v5954_v4 }
 0x22c   : > { %v1829_v34 = vpack.c.bf16 %v5375_v12, %v5374_v1 }
 0x22d   : > { %v1638_v32 = vpop.f32.mrf.mxu0 }
 0x22e   : > { %v1828_v33 = vpack.c.bf16 %v1638_v32, %v1635_v9  ;;  %5479 = vmatpush3.bf16.msra.mxu1 %v5954_v4 }
 0x22f   : > { %v5378_v35 = vpop.f32.mrf.mxu0  ;;  %5496 = vmatprep.subr.bf16.mxu1 %v5955_v17 }
 0x230   : > { %5464 = vmatprep.mubr.msk.bf16.mxu1 %vm1866_vm2, %v1828_v33 }
 0x231   : > { %v1651_v37 = vpop.f32.mrf.mxu0  ;;  %5465 = vmatmul.mubr.msk.bf16.gmra.mxu1 %vm1866_vm2, %v1829_v34 }
 0x233   : > { %v5379_v38 = vpop.f32.mrf.mxu0 }
 0x234   : > { %v1831_v40 = vpack.c.bf16 %v5379_v38, %v5378_v35 }
 0x235   : > { %v1654_v39 = vpop.f32.mrf.mxu0 }
 0x236   : > { %v1830_v36 = vpack.c.bf16 %v1654_v39, %v1651_v37 }
 0x237   : > { %v5382_v41 = vpop.f32.mrf.mxu0 }
 0x238   : > { %5468 = vmatprep.mubr.msk.bf16.mxu1 %vm1866_vm2, %v1830_v36 }
 0x239   : > { %v1667_v42 = vpop.f32.mrf.mxu0  ;;  %5469 = vmatmul.mubr.msk.bf16.gmra.mxu1 %vm1866_vm2, %v1831_v40 }
 0x23b   : > { %v5383_v43 = vpop.f32.mrf.mxu0 }
 0x23c   : > { %v1833_v47 = vpack.c.bf16 %v5383_v43, %v5382_v41 }
 0x23d   : > { %v1670_v45 = vpop.f32.mrf.mxu0 }
 0x23e   : > { %v1832_v46 = vpack.c.bf16 %v1670_v45, %v1667_v42 }
 0x23f   : > { %v5386_v48 = vpop.f32.mrf.mxu0 }
 0x240   : > { %5472 = vmatprep.mubr.msk.bf16.mxu1 %vm1866_vm2, %v1832_v46 }
 0x241   : > { %v1683_v49 = vpop.f32.mrf.mxu0  ;;  %5473 = vmatmul.mubr.msk.bf16.gmra.mxu1 %vm1866_vm2, %v1833_v47 }
 0x243   : > { %v5387_v50 = vpop.f32.mrf.mxu0 }
 0x244   : > { %v1835_v52 = vpack.c.bf16 %v5387_v50, %v5386_v48  ;;  %v5961_v50 = vld [vmem:[%s7124_s6 + $0xe8] sm:$0xff]  }
 0x245   : > { %v1686_v44 = vpop.f32.mrf.mxu0  ;;  %5518 = vmatprep.subr.bf16.mxu0 %v5961_v50 }
 0x246   : > { %v1834_v51 = vpack.c.bf16 %v1686_v44, %v1683_v49  ;;  %v5958_v49 = vld [vmem:[%s7124_s6 + $0xd8] sm:$0xff]   ;;  %5519 = vmatpush3.bf16.msra.mxu0 %v5961_v50 }
 0x247   : > { %v5390_v53 = vpop.f32.mrf.mxu0 }
 0x248   : > { %5480 = vmatprep.mubr.msk.bf16.mxu1 %vm1866_vm2, %v1834_v51  ;;  %v5306_v51 = vpop.f32.mrf.mxu1 }
 0x249   : > { %v1699_v56 = vpop.f32.mrf.mxu0  ;;  %5481 = vmatmul.mubr.msk.bf16.vlgmr.msra.gmra.mxu1 %vm1866_vm2, %v1835_v52 }
 0x24a   : > { %5497 = vmatpush3.bf16.msra.mxu1 %v5955_v17 }
 0x24b   : > { %v5391_v57 = vpop.f32.mrf.mxu0  ;;  %5498 = vmatprep.subr.bf16.mxu1 %v5956_v54 }
 0x24c   : > { %v1837_v4 = vpack.c.bf16 %v5391_v57, %v5390_v53  ;;  %v5960_v53 = vld [vmem:[%s7124_s6 + $0xc8] sm:$0xff]   ;;  %v1154_v57 = vpop.f32.mrf.mxu1 }
 0x24d   : > { %v1702_v62 = vpop.f32.mrf.mxu0 }
 0x24e   : > { %v1836_v1 = vpack.c.bf16 %v1702_v62, %v1699_v56  ;;  %5499 = vmatpush3.bf16.msra.mxu1 %v5956_v54 }
 0x24f   : > { %v5394_v9 = vpop.f32.mrf.mxu0  ;;  %5536 = vmatprep.subr.bf16.mxu1 %v5957_v60 }
 0x250   : > { %5484 = vmatprep.mubr.msk.bf16.mxu1 %vm1866_vm2, %v1836_v1 }
 0x251   : > { %v1715_v12 = vpop.f32.mrf.mxu0  ;;  %5485 = vmatmul.mubr.msk.bf16.gmra.mxu1 %vm1866_vm2, %v1837_v4 }
 0x253   : > { %v5395_v32 = vpop.f32.mrf.mxu0 }
 0x254   : > { %v1839_v34 = vpack.c.bf16 %v5395_v32, %v5394_v9 }
 0x255   : > { %v1718_v33 = vpop.f32.mrf.mxu0 }
 0x256   : > { %v1838_v17 = vpack.c.bf16 %v1718_v33, %v1715_v12 }
 0x257   : > { %v5398_v35 = vpop.f32.mrf.mxu0 }
 0x258   : > { %5488 = vmatprep.mubr.msk.bf16.mxu1 %vm1866_vm2, %v1838_v17 }
 0x259   : > { %v1731_v37 = vpop.f32.mrf.mxu0  ;;  %5489 = vmatmul.mubr.msk.bf16.gmra.mxu1 %vm1866_vm2, %v1839_v34 }
 0x25b   : > { %v5399_v38 = vpop.f32.mrf.mxu0 }
 0x25c   : > { %v1841_v40 = vpack.c.bf16 %v5399_v38, %v5398_v35 }
 0x25d   : > { %v1734_v39 = vpop.f32.mrf.mxu0 }
 0x25e   : > { %v1840_v36 = vpack.c.bf16 %v1734_v39, %v1731_v37 }
 0x25f   : > { %v5402_v41 = vpop.f32.mrf.mxu0 }
 0x260   : > { %5492 = vmatprep.mubr.msk.bf16.mxu1 %vm1866_vm2, %v1840_v36 }
 0x261   : > { %v1747_v42 = vpop.f32.mrf.mxu0  ;;  %5493 = vmatmul.mubr.msk.bf16.gmra.mxu1 %vm1866_vm2, %v1841_v40 }
 0x263   : > { %v5403_v43 = vpop.f32.mrf.mxu0 }
 0x264   : > { %v1843_v47 = vpack.c.bf16 %v5403_v43, %v5402_v41 }
 0x265   : > { %v1750_v45 = vpop.f32.mrf.mxu0 }
 0x266   : > { %v1842_v46 = vpack.c.bf16 %v1750_v45, %v1747_v42 }
 0x267   : > { %v5406_v48 = vpop.f32.mrf.mxu0 }
 0x268   : > { %5500 = vmatprep.mubr.msk.bf16.mxu1 %vm1866_vm2, %v1842_v46 }
 0x269   : > { %v1763_v44 = vpop.f32.mrf.mxu0  ;;  %5501 = vmatmul.mubr.msk.bf16.vlgmr.msra.gmra.mxu1 %vm1866_vm2, %v1843_v47 }
 0x26a   : > { %5537 = vmatpush3.bf16.msra.mxu1 %v5957_v60  ;;  %v5307_v60 = vpop.f32.mrf.mxu1 }
 0x26b   : > { %v5407_v52 = vpop.f32.mrf.mxu0  ;;  %5538 = vmatprep.subr.bf16.mxu1 %v5958_v49 }
 0x26c   : > { %v1845_v62 = vpack.c.bf16 %v5407_v52, %v5406_v48  ;;  %v6497_v33 = vpop.f32.mrf.mxu1 }
 0x26d   : > { %v1766_v54 = vpop.f32.mrf.mxu0 }
 0x26e   : > { %v1844_v56 = vpack.c.bf16 %v1766_v54, %v1763_v44  ;;  %5539 = vmatpush3.bf16.msra.mxu1 %v5958_v49  ;;  %v5310_v37 = vpop.f32.mrf.mxu1 }
 0x26f   : > { %v5410_v1 = vpop.f32.mrf.mxu0  ;;  %5574 = vmatprep.subr.bf16.mxu1 %v5960_v53 }
 0x270   : > { %5504 = vmatprep.mubr.msk.bf16.mxu1 %vm1866_vm2, %v1844_v56  ;;  %v1170_v40 = vpop.f32.mrf.mxu1 }
 0x271   : > { %v1779_v4 = vpop.f32.mrf.mxu0  ;;  %5505 = vmatmul.mubr.msk.bf16.gmra.mxu1 %vm1866_vm2, %v1845_v62 }
 0x272   : > { %v5311_v42 = vpop.f32.mrf.mxu1 }
 0x273   : > { %v5411_v9 = vpop.f32.mrf.mxu0 }
 0x274   : > { %v1847_v17 = vpack.c.bf16 %v5411_v9, %v5410_v1  ;;  %v6505_v43 = vpop.f32.mrf.mxu1 }
 0x275   : > { %v1782_v12 = vpop.f32.mrf.mxu0 }
 0x276   : > { %v1846_v32 = vpack.c.bf16 %v1782_v12, %v1779_v4  ;;  %v5314_v45 = vpop.f32.mrf.mxu1 }
 0x277   : > { %v5414_v34 = vpop.f32.mrf.mxu0 }
 0x278   : > { %5508 = vmatprep.mubr.msk.bf16.mxu1 %vm1866_vm2, %v1846_v32  ;;  %v1186_v46 = vpop.f32.mrf.mxu1 }
 0x279   : > { %v1795_v35 = vpop.f32.mrf.mxu0  ;;  %5509 = vmatmul.mubr.msk.bf16.gmra.mxu1 %vm1866_vm2, %v1847_v17 }
 0x27a   : > { %v5315_v47 = vpop.f32.mrf.mxu1 }
 0x27b   : > { %v5415_v38 = vpop.f32.mrf.mxu0 }
 0x27c   : > { %v1849_v41 = vpack.c.bf16 %v5415_v38, %v5414_v34 }
 0x27d   : > { %v1798_v39 = vpop.f32.mrf.mxu0 }
 0x27e   : > { %v1848_v36 = vpack.c.bf16 %v1798_v39, %v1795_v35 }
 0x280   : > { %5512 = vmatprep.mubr.msk.bf16.mxu1 %vm1866_vm2, %v1848_v36 }
 0x281   : > { %5513 = vmatmul.mubr.msk.bf16.gmra.mxu1 %vm1866_vm2, %v1849_v41 }
 0x282   : > { %5540 = vmatprep.mubr.msk.bf16.mxu1 %vm1866_vm2, %v6328_v18  ;;  %v6515_v18 = vpop.f32.mrf.mxu1 }
 0x289   : > { %5541 = vmatmul.mubr.msk.bf16.vlgmr.msra.gmra.mxu1 %vm1866_vm2, %v6320_v15  ;;  %v5318_v15 = vpop.f32.mrf.mxu1 }
 0x28a   : > { %5544 = vmatprep.mubr.msk.bf16.mxu1 %vm1866_vm2, %v6312_v10  ;;  %5575 = vmatpush3.bf16.msra.mxu1 %v5960_v53 }
 0x28b   : > { %v1202_v10 = vpop.f32.mrf.mxu1 }
 0x291   : > { %5545 = vmatmul.mubr.msk.bf16.gmra.mxu1 %vm1866_vm2, %v6304_v7  ;;  %v5319_v7 = vpop.f32.mrf.mxu1 }
 0x292   : > { %5548 = vmatprep.mubr.msk.bf16.mxu1 %vm1866_vm2, %v6296_v2  ;;  %v1163_v2 = vadd.f32 %v5306_v51, %v6387_v0  ;;  %v1179_v0 = vadd.f32 %v5310_v37, %v6399_v16  ;;  %v1195_v16 = vadd.f32 %v5314_v45, %v6408_v24  ;;  %v1214_v17 = vadd.f32 %v5319_v7, %v6420_v30 }
 0x293   : > { %v6525_v48 = vpop.f32.mrf.mxu1 }
 0x299   : > { %5549 = vmatmul.mubr.msk.bf16.gmra.mxu1 %vm1866_vm2, %v6288_v63  ;;  %v1155_v63 = vadd.f32 %v1154_v57, %v6391_v6 }
 0x29a   : > { %5552 = vmatprep.mubr.msk.bf16.mxu1 %vm1866_vm2, %v6279_v58 }
 0x2a1   : > { %5553 = vmatmul.mubr.msk.bf16.gmra.mxu1 %vm1866_vm2, %v6277_v55  ;;  %v1166_v55 = vadd.f32 %v5307_v60, %v6393_v8  ;;  %v1182_v8 = vadd.f32 %v5311_v42, %v6404_v22  ;;  %v1198_v22 = vadd.f32 %v5315_v47, %v6412_v26  ;;  %v6555_v60 = vld [vmem:[%s7124_s6 + $0xd0] sm:$0xff]  }
 0x2a2   : > { %5576 = vmatprep.mubr.msk.bf16.mxu1 %vm968_vm1, %v6285_v61  ;;  %5556 = vmatprep.subr.bf16.mxu0 %v6555_v60 }
 0x2a9   : > { %v5422_v49 = vpop.f32.mrf.mxu1  ;;  %5577 = vmatmul.mubr.msk.bf16.vlgmr.msra.gmra.mxu1 %vm968_vm1, %v6282_v59  ;;  %v1171_v59 = vadd.f32 %v1170_v40, %v6402_v20 }
 0x2aa   : > { %v1990_v58 = vadd.f32 %v5422_v49, %v1163_v2  ;;  %5580 = vmatprep.mubr.msk.bf16.mxu1 %vm968_vm1, %v6301_v5 }
 0x2ab   : > { %v1925_v50 = vpop.f32.mrf.mxu1 }
 0x2ac   : > { %v1988_v44 = vadd.f32 %v1925_v50, %v1155_v63 }
 0x2ad   : > { %v5423_v61 = vpop.f32.mrf.mxu1 }
 0x2ae   : > { %v1991_v52 = vadd.f32 %v5423_v61, %v1166_v55 }
 0x2af   : > { %v6534_v53 = vpop.f32.mrf.mxu1 }
 0x2b1   : > { %v5426_v51 = vpop.f32.mrf.mxu1  ;;  %5581 = vmatmul.mubr.msk.bf16.gmra.mxu1 %vm968_vm1, %v6298_v3  ;;  %v1187_v3 = vadd.f32 %v1186_v46, %v6410_v25  ;;  %v1211_v25 = vadd.f32 %v5318_v15, %v6416_v28 }
 0x2b2   : > { %v1994_v6 = vadd.f32 %v5426_v51, %v1179_v0  ;;  %5584 = vmatprep.mubr.msk.bf16.mxu1 %vm968_vm1, %v6317_v13 }
 0x2b3   : > { %v1941_v5 = vpop.f32.mrf.mxu1 }
 0x2b4   : > { %v1992_v54 = vadd.f32 %v1941_v5, %v1171_v59 }
 0x2b5   : > { %v5427_v56 = vpop.f32.mrf.mxu1 }
 0x2b6   : > { %v1995_v57 = vadd.f32 %v5427_v56, %v1182_v8 }
 0x2b7   : > { %v6543_v62 = vpop.f32.mrf.mxu1 }
 0x2b9   : > { %v5430_v1 = vpop.f32.mrf.mxu1  ;;  %5585 = vmatmul.mubr.msk.bf16.gmra.mxu1 %vm968_vm1, %v6314_v11 }
 0x2ba   : > { %v1998_v20 = vadd.f32 %v5430_v1, %v1195_v16  ;;  %5588 = vmatprep.mubr.msk.bf16.mxu1 %vm968_vm1, %v6333_v21  ;;  %v1203_v21 = vadd.f32 %v1202_v10, %v6418_v29 }
 0x2bb   : > { %v1957_v13 = vpop.f32.mrf.mxu1 }
 0x2bc   : > { %v1996_v4 = vadd.f32 %v1957_v13, %v1187_v3 }
 0x2bd   : > { %v5431_v24 = vpop.f32.mrf.mxu1 }
 0x2be   : > { %v1999_v9 = vadd.f32 %v5431_v24, %v1198_v22 }
 0x2bf   : > { %v6558_v11 = vpop.f32.mrf.mxu1 }
 0x2c1   : > { %v5434_v12 = vpop.f32.mrf.mxu1  ;;  %5589 = vmatmul.mubr.msk.bf16.gmra.mxu1 %vm968_vm1, %v6330_v19 }
 0x2c2   : > { %v2002_v26 = vadd.f32 %v5434_v12, %v1211_v25 }
 0x2c3   : > { %v1973_v32 = vpop.f32.mrf.mxu1 }
 0x2c4   : > { %v2000_v34 = vadd.f32 %v1973_v32, %v1203_v21 }
 0x2c5   : > { %v5435_v35 = vpop.f32.mrf.mxu1 }
 0x2c6   : > { %v2003_v37 = vadd.f32 %v5435_v35, %v1214_v17 }
 0x2c7   : > { %v6565_v38 = vpop.f32.mrf.mxu1 }
 0x2c9   : > { %v5442_v39 = vpop.f32.mrf.mxu1 }
 0x2ca   : > { %v2143_v36 = vadd.f32 %v5442_v39, %v1990_v58 }
 0x2cb   : > { %v2078_v40 = vpop.f32.mrf.mxu1 }
 0x2cc   : > { %v2141_v41 = vadd.f32 %v2078_v40, %v1988_v44 }
 0x2cd   : > { %v5443_v28 = vpop.f32.mrf.mxu1 }
 0x2ce   : > { %v6567_v42 = vadd.f32 %v5443_v28, %v1991_v52 }
 0x2cf   : > { %v6569_v45 = vpop.f32.mrf.mxu1 }
 0x2d1   : > { %v5446_v19 = vpop.f32.mrf.mxu1 }
 0x2d2   : > { %v2147_v29 = vadd.f32 %v5446_v19, %v1994_v6 }
 0x2d3   : > { %v2094_v46 = vpop.f32.mrf.mxu1 }
 0x2d4   : > { %v2145_v47 = vadd.f32 %v2094_v46, %v1992_v54 }
 0x2d5   : > { %v5447_v15 = vpop.f32.mrf.mxu1 }
 0x2d6   : > { %v6571_v30 = vadd.f32 %v5447_v15, %v1995_v57 }
 0x2d7   : > { %v6573_v10 = vpop.f32.mrf.mxu1 }
 0x2d9   : > { %v5450_v7 = vpop.f32.mrf.mxu1 }
 0x2da   : > { %v2151_v2 = vadd.f32 %v5450_v7, %v1998_v20 }
 0x2db   : > { %v2110_v49 = vpop.f32.mrf.mxu1 }
 0x2dc   : > { %v2149_v63 = vadd.f32 %v2110_v49, %v1996_v4 }
 0x2dd   : > { %v5451_v58 = vpop.f32.mrf.mxu1 }
 0x2de   : > { %v6575_v50 = vadd.f32 %v5451_v58, %v1999_v9 }
 0x2df   : > { %v6577_v55 = vpop.f32.mrf.mxu1 }
 0x2e1   : > { %v5454_v44 = vpop.f32.mrf.mxu1 }
 0x2e2   : > { %v2155_v61 = vadd.f32 %v5454_v44, %v2002_v26 }
 0x2e3   : > { %v2126_v52 = vpop.f32.mrf.mxu1 }
 0x2e4   : > { %v2153_v0 = vadd.f32 %v2126_v52, %v2000_v34 }
 0x2e5   : > { %v5455_v51 = vpop.f32.mrf.mxu1 }
 0x2e6   : > { %v6579_v59 = vadd.f32 %v5455_v51, %v2003_v37 }
 0x2e7   : > { %v6581_v6 = vpop.f32.mrf.mxu1 }
 0x2e9   : > { %v5462_v5 = vpop.f32.mrf.mxu1 }
 0x2ea   : > { %v2296_v8 = vadd.f32 %v5462_v5, %v2143_v36 }
 0x2eb   : > { %v2231_v54 = vpop.f32.mrf.mxu1 }
 0x2ec   : > { %v2294_v56 = vadd.f32 %v2231_v54, %v2141_v41 }
 0x2ed   : > { %v5463_v57 = vpop.f32.mrf.mxu1 }
 0x2ee   : > { %v2297_v54 = vadd.f32 %v5463_v57, %v6567_v42 }
 0x2ef   : > { %v2234_v16 = vpop.f32.mrf.mxu1 }
 0x2f1   : > { %v5466_v1 = vpop.f32.mrf.mxu1 }
 0x2f2   : > { %v2300_v3 = vadd.f32 %v5466_v1, %v2147_v29 }
 0x2f3   : > { %v2247_v20 = vpop.f32.mrf.mxu1 }
 0x2f4   : > { %v2298_v13 = vadd.f32 %v2247_v20, %v2145_v47 }
 0x2f5   : > { %v5467_v22 = vpop.f32.mrf.mxu1 }
 0x2f7   : > { %v2250_v4 = vpop.f32.mrf.mxu1 }
 0x2f9   : > { %v5470_v24 = vpop.f32.mrf.mxu1 }
 0x2fa   : > { %v6583_v9 = vadd.f32 %v5470_v24, %v2151_v2 }
 0x2fb   : > { %v2263_v25 = vpop.f32.mrf.mxu1 }
 0x2fc   : > { %v6585_v12 = vadd.f32 %v2263_v25, %v2149_v63 }
 0x2fd   : > { %v6587_v21 = vpop.f32.mrf.mxu1 }
 0x2ff   : > { %v6589_v26 = vpop.f32.mrf.mxu1 }
 0x301   : > { %v5474_v32 = vpop.f32.mrf.mxu1 }
 0x302   : > { %v6591_v17 = vadd.f32 %v5474_v32, %v2155_v61  ;;  %v1158_v61 = vadd.f32 %v6497_v33, %v6397_v14 }
 0x303   : > { %v2279_v34 = vpop.f32.mrf.mxu1 }
 0x304   : > { %v6593_v35 = vadd.f32 %v2279_v34, %v2153_v0  ;;  %v1989_v0 = vadd.f32 %v6534_v53, %v1158_v61 }
 0x305   : > { %v6595_v37 = vpop.f32.mrf.mxu1 }
 0x306   : > { %7128 = vst [vmem:[#allocation5_spill] sm:$0xff] %v6593_v35  ;;  %v2142_v5 = vadd.f32 %v6569_v45, %v1989_v0 }
 0x307   : > { %v6597_v39 = vpop.f32.mrf.mxu1 }
 0x308   : > { %v2295_v24 = vadd.f32 %v2234_v16, %v2142_v5 }
 0x309   : > { %v5482_v36 = vpop.f32.mrf.mxu1 }
 0x30a   : > { %v2449_v1 = vadd.f32 %v5482_v36, %v2296_v8  ;;  %v2301_v8 = vadd.f32 %v5467_v22, %v6571_v30 }
 0x30b   : > { %v2384_v40 = vpop.f32.mrf.mxu1 }
 0x30c   : > { %v2447_v25 = vadd.f32 %v2384_v40, %v2294_v56 }
 0x30d   : > { %v5483_v41 = vpop.f32.mrf.mxu1 }
 0x30e   : > { %v2450_v32 = vadd.f32 %v5483_v41, %v2297_v54 }
 0x30f   : > { %v2387_v28 = vpop.f32.mrf.mxu1 }
 0x310   : > { %v2448_v14 = vadd.f32 %v2387_v28, %v2295_v24 }
 0x311   : > { %v5486_v19 = vpop.f32.mrf.mxu1 }
 0x312   : > { %v2453_v57 = vadd.f32 %v5486_v19, %v2300_v3 }
 0x313   : > { %v2400_v29 = vpop.f32.mrf.mxu1 }
 0x314   : > { %v2451_v41 = vadd.f32 %v2400_v29, %v2298_v13 }
 0x315   : > { %v5487_v46 = vpop.f32.mrf.mxu1 }
 0x316   : > { %v2454_v28 = vadd.f32 %v5487_v46, %v2301_v8 }
 0x317   : > { %v2403_v47 = vpop.f32.mrf.mxu1 }
 0x319   : > { %v5490_v15 = vpop.f32.mrf.mxu1 }
 0x31a   : > { %v2457_v29 = vadd.f32 %v5490_v15, %v6583_v9 }
 0x31b   : > { %v6599_v7 = vpop.f32.mrf.mxu1 }
 0x31d   : > { %v6601_v2 = vpop.f32.mrf.mxu1 }
 0x31f   : > { %v6603_v49 = vpop.f32.mrf.mxu1 }
 0x321   : > { %v6605_v63 = vpop.f32.mrf.mxu1 }
 0x323   : > { %v6607_v58 = vpop.f32.mrf.mxu1 }
 0x324   : > { %7129 = vst [vmem:[#allocation6_spill] sm:$0xff] %v6607_v58 }
 0x325   : > { %v6609_v44 = vpop.f32.mrf.mxu1 }
 0x326   : > { %7130 = vst [vmem:[#allocation7_spill] sm:$0xff] %v6609_v44  ;;  %v1174_v44 = vadd.f32 %v6505_v43, %v6406_v23 }
 0x327   : > { %v6613_v52 = vpop.f32.mrf.mxu1 }
 0x328   : > { %7131 = vst [vmem:[#allocation8_spill] sm:$0xff] %v6613_v52  ;;  %v1993_v53 = vadd.f32 %v6543_v62, %v1174_v44  ;;  %v1190_v44 = vadd.f32 %v6515_v18, %v6414_v27  ;;  %v2305_v18 = vadd.f32 %v6587_v21, %v6575_v50  ;;  %v1206_v50 = vadd.f32 %v6525_v48, %v6422_v31 }
 0x329   : > { %v5502_v51 = vpop.f32.mrf.mxu1  ;;  %v2309_v31 = vadd.f32 %v6595_v37, %v6579_v59 }
 0x32a   : > { %v2602_v34 = vadd.f32 %v5502_v51, %v2449_v1  ;;  %v2146_v42 = vadd.f32 %v6573_v10, %v1993_v53  ;;  %v1997_v3 = vadd.f32 %v6558_v11, %v1190_v44  ;;  %v2455_v1 = vadd.f32 %v6599_v7, %v6585_v12  ;;  %v5975_v44 = vld [vmem:[%s6255_s9] sm:$0xff]  }
 0x32b   : > { %v2537_v20 = vpop.f32.mrf.mxu1 }
 0x32c   : > { %v2600_v33 = vadd.f32 %v2537_v20, %v2447_v25  ;;  %v2618_v35 = vmax.f32 %v2602_v34, 0.0  ;;  %v2299_v43 = vadd.f32 %v2250_v4, %v2146_v42  ;;  %v2150_v27 = vadd.f32 %v6577_v55, %v1997_v3  ;;  %v5980_v3 = vld [vmem:[%s6255_s9 + $0x28] sm:$0xff]  }
 0x32d   : > { %v5503_v58 = vpop.f32.mrf.mxu1  ;;  %v7134_v42 = vld [vmem:[#allocation7_spill] sm:$0xff] }
 0x32e   : > { %v2603_v52 = vadd.f32 %v5503_v58, %v2450_v32  ;;  %v2616_v16 = vmax.f32 %v2600_v33, 0.0  ;;  %v2452_v10 = vadd.f32 %v2403_v47, %v2299_v43  ;;  %v2303_v5 = vadd.f32 %v6589_v26, %v2150_v27  ;;  %v5985_v27 = vld [vmem:[%s6237_s29 + $0x10] sm:$0xff]  }
 0x32f   : > { %v2540_v61 = vpop.f32.mrf.mxu1  ;;  %v2001_v26 = vadd.f32 %v6565_v38, %v1206_v50  ;;  %v2462_v8 = vadd.f32 %v7134_v42, %v2309_v31  ;;  %v5999_v50 = vld [vmem:[%s6237_s29 + $0x80] sm:$0xff]   ;;  %v6008_v31 = vld [vmem:[%s6237_s29 + $0xc8] sm:$0xff]  }
 0x330   : > { %v2619_v45 = vmax.f32 %v2603_v52, 0.0  ;;  %v2601_v0 = vadd.f32 %v2540_v61, %v2448_v14  ;;  %v2456_v9 = vadd.f32 %v6603_v49, %v2303_v5  ;;  %v2461_v49 = vadd.f32 %v6605_v63, %v6591_v17  ;;  %v7132_v61 = vld [vmem:[#allocation5_spill] sm:$0xff]  ;;  %v5994_v5 = vld [vmem:[%s6237_s29 + $0x58] sm:$0xff]  }
 0x331   : > { %v5506_v56 = vpop.f32.mrf.mxu1  ;;  %v2154_v32 = vadd.f32 %v6581_v6, %v2001_v26  ;;  %v6003_v26 = vld [vmem:[%s6237_s29 + $0xa0] sm:$0xff]  }
 0x332   : > { %v6623_v36 = vpack.c.bf16 %v2619_v45, %v2618_v35  ;;  %v2617_v23 = vmax.f32 %v2601_v0, 0.0  ;;  %v2606_v62 = vadd.f32 %v5506_v56, %v2453_v57  ;;  %v7133_v45 = vld [vmem:[#allocation6_spill] sm:$0xff] }
 0x333   : > { %v2553_v40 = vpop.f32.mrf.mxu1  ;;  %v2307_v38 = vadd.f32 %v6597_v39, %v2154_v32  ;;  %v2459_v0 = vadd.f32 %v7133_v45, %v7132_v61  ;;  %v6007_v32 = vld [vmem:[%s6237_s29 + $0xc0] sm:$0xff]   ;;  %v6016_v45 = vld [vmem:[%s6237_s29 + $0x108] sm:$0xff]  }
 0x334   : > { %v6625_v58 = vpack.c.bf16 %v2617_v23, %v2616_v16  ;;  %v2604_v51 = vadd.f32 %v2553_v40, %v2451_v41  ;;  %v2622_v13 = vmax.f32 %v2606_v62, 0.0  ;;  %v7135_v16 = vld [vmem:[#allocation8_spill] sm:$0xff] }
 0x335   : > { %v5507_v52 = vpop.f32.mrf.mxu1  ;;  %v2460_v59 = vadd.f32 %v7135_v16, %v2307_v38  ;;  %v6014_v38 = vld [vmem:[%s6237_s29 + $0xf8] sm:$0xff]   ;;  %v6019_v16 = vld [vmem:[%s6237_s29 + $0x120] sm:$0xff]  }
 0x336   : > { %v2607_v30 = vadd.f32 %v5507_v52, %v2454_v28  ;;  %5520 = vmatprep.mubr.msk.bf16.mxu0 %vm1866_vm2, %v6625_v58  ;;  %v2620_v46 = vmax.f32 %v2604_v51, 0.0  ;;  %v5976_v52 = vld [vmem:[%s6255_s9 + $0x8] sm:$0xff]   ;;  %v5978_v51 = vld [vmem:[%s6255_s9 + $0x18] sm:$0xff]  }
 0x337   : > { %v2556_v22 = vpop.f32.mrf.mxu1  ;;  %5521 = vmatmul.mubr.msk.bf16.vlgmr.msra.gmra.mxu0 %vm1866_vm2, %v6623_v36 }
 0x338   : > { %v2623_v4 = vmax.f32 %v2607_v30, 0.0  ;;  %v2605_v35 = vadd.f32 %v2556_v22, %v2452_v10  ;;  %5557 = vmatpush3.bf16.msra.mxu0 %v6555_v60  ;;  %v2458_v60 = vadd.f32 %v6601_v2, %v2305_v18  ;;  %v5977_v10 = vld [vmem:[%s6255_s9 + $0x10] sm:$0xff]   ;;  %v5979_v30 = vld [vmem:[%s6255_s9 + $0x20] sm:$0xff]   ;;  %v5986_v18 = vld [vmem:[%s6237_s29 + $0x18] sm:$0xff]  }
 0x339   : > { %v5510_v19 = vpop.f32.mrf.mxu1  ;;  %v5981_v22 = vld [vmem:[%s6255_s9 + $0x30] sm:$0xff]  }
 0x33a   : > { %v6639_v47 = vpack.c.bf16 %v2623_v4, %v2622_v13  ;;  %v2621_v11 = vmax.f32 %v2605_v35, 0.0  ;;  %v2610_v55 = vadd.f32 %v5510_v19, %v2457_v29  ;;  %v5982_v13 = vld [vmem:[%s6255_s9 + $0x38] sm:$0xff]   ;;  %v5983_v4 = vld [vmem:[%s6237_s29] sm:$0xff]   ;;  %v5984_v35 = vld [vmem:[%s6237_s29 + $0x8] sm:$0xff]   ;;  %s4674_s9 = sshll.u32 %s6184_s17, 2  ;;  %s4925_s17 = sshll.u32 %s6149_s28, 7 }
 0x33b   : > { %v2569_v54 = vpop.f32.mrf.mxu1  ;;  %v5987_v19 = vld [vmem:[%s6237_s29 + $0x20] sm:$0xff]   ;;  %v5989_v29 = vld [vmem:[%s6237_s29 + $0x30] sm:$0xff]   ;;  %s373_s15 = scalar_lea.vmem %s7123_s5, %s4674_s9  ;;  %s7076_s23 = scalar_lea.hbm %s7125_s7, %s4925_s17 }
 0x33c   : > { %v6645_v20 = vpack.c.bf16 %v2621_v11, %v2620_v46  ;;  %v2608_v15 = vadd.f32 %v2569_v54, %v2455_v1  ;;  %v2626_v12 = vmax.f32 %v2610_v55, 0.0  ;;  %v5990_v46 = vld [vmem:[%s6237_s29 + $0x38] sm:$0xff]   ;;  %v5993_v11 = vld [vmem:[%s6237_s29 + $0x50] sm:$0xff]   ;;  %v5995_v54 = vld [vmem:[%s6237_s29 + $0x60] sm:$0xff]   ;;  %s6087_s28 = smov [#allocation2]  }
 0x33d   : > { %v5511_v21 = vpop.f32.mrf.mxu1  ;;  %v5963_v1 = vld [vmem:[%s7124_s6 + $0x80] sm:$0xff]   ;;  %v5998_v55 = vld [vmem:[%s6237_s29 + $0x78] sm:$0xff]   ;;  %s6027_s9 = sshll.u32 %s6087_s28, 4  ;;  %s6028_s9 = int_to_ptr.vmem [resolvable:$false] %s6027_s9 }
 0x33e   : > { %v2611_v24 = vadd.f32 %v5511_v21, %v2458_v60  ;;  %5524 = vmatprep.mubr.msk.bf16.mxu0 %vm1866_vm2, %v6645_v20  ;;  %v2624_v34 = vmax.f32 %v2608_v15, 0.0  ;;  %5688 = vmatprep.subr.bf16.mxu1 %v5963_v1  ;;  %v5996_v60 = vld [vmem:[%s6237_s29 + $0x68] sm:$0xff]   ;;  %v5964_v21 = vld [vmem:[%s7124_s6 + $0x78] sm:$0xff]   ;;  %v6001_v15 = vld [vmem:[%s6237_s29 + $0x90] sm:$0xff]   ;;  %s6029_s18 = scalar_lea.vmem %s6028_s9, 256 }
 0x33f   : > { %v2572_v25 = vpop.f32.mrf.mxu1  ;;  %5525 = vmatmul.mubr.msk.bf16.gmra.mxu0 %vm1866_vm2, %v6639_v47  ;;  %5689 = vmatpush3.bf16.msra.mxu1 %v5963_v1 }
 0x340   : > { %v2627_v7 = vmax.f32 %v2611_v24, 0.0  ;;  %v2609_v2 = vadd.f32 %v2572_v25, %v2456_v9  ;;  %5690 = vmatprep.subr.bf16.mxu1 %v5964_v21  ;;  %v6000_v9 = vld [vmem:[%s6237_s29 + $0x88] sm:$0xff]   ;;  %v6002_v24 = vld [vmem:[%s6237_s29 + $0x98] sm:$0xff]   ;;  %v6723_v25 = vld [vmem:[%s7124_s6 + $0x90] sm:$0xff]  }
 0x341   : > { %v5514_v48 = vpop.f32.mrf.mxu1 }
 0x342   : > { %v2637_v14 = vpack.c.bf16 %v2627_v7, %v2626_v12  ;;  %v2625_v33 = vmax.f32 %v2609_v2, 0.0  ;;  %v2614_v6 = vadd.f32 %v5514_v48, %v2461_v49  ;;  %v6004_v12 = vld [vmem:[%s6237_s29 + $0xa8] sm:$0xff]   ;;  %v6005_v7 = vld [vmem:[%s6237_s29 + $0xb0] sm:$0xff]   ;;  %v6006_v2 = vld [vmem:[%s6237_s29 + $0xb8] sm:$0xff]  }
 0x343   : > { %v2585_v53 = vpop.f32.mrf.mxu1  ;;  %5691 = vmatpush3.bf16.msra.mxu1 %v5964_v21  ;;  %v6009_v48 = vld [vmem:[%s6237_s29 + $0xd0] sm:$0xff]   ;;  %v6010_v49 = vld [vmem:[%s6237_s29 + $0xd8] sm:$0xff]   ;;  %v5966_v21 = vld [vmem:[%s7124_s6 + $0x88] sm:$0xff]  }
 0x344   : > { %v2636_v56 = vpack.c.bf16 %v2625_v33, %v2624_v34  ;;  %v2612_v37 = vadd.f32 %v2585_v53, %v2459_v0  ;;  %v2630_v39 = vmax.f32 %v2614_v6, 0.0  ;;  %5708 = vmatprep.subr.bf16.mxu1 %v6723_v25  ;;  %v6011_v34 = vld [vmem:[%s6237_s29 + $0xe0] sm:$0xff]   ;;  %v6013_v33 = vld [vmem:[%s6237_s29 + $0xf0] sm:$0xff]  }
 0x345   : > { %v5515_v57 = vpop.f32.mrf.mxu1  ;;  %v6015_v53 = vld [vmem:[%s6237_s29 + $0x100] sm:$0xff]   ;;  %v6017_v0 = vld [vmem:[%s6237_s29 + $0x110] sm:$0xff]  }
 0x346   : > { %v2615_v23 = vadd.f32 %v5515_v57, %v2462_v8  ;;  %5528 = vmatprep.mubr.msk.bf16.mxu0 %vm1866_vm2, %v2636_v56  ;;  %v2628_v40 = vmax.f32 %v2612_v37, 0.0  ;;  %v6018_v57 = vld [vmem:[%s6237_s29 + $0x118] sm:$0xff]  }
 0x347   : > { %v2588_v17 = vpop.f32.mrf.mxu1  ;;  %5529 = vmatmul.mubr.msk.bf16.gmra.mxu0 %vm1866_vm2, %v2637_v14 }
 0x348   : > { %v2631_v63 = vmax.f32 %v2615_v23, 0.0  ;;  %v2613_v43 = vadd.f32 %v2588_v17, %v2460_v59 }
 0x34a   : > { %v2639_v41 = vpack.c.bf16 %v2631_v63, %v2630_v39  ;;  %v2629_v28 = vmax.f32 %v2613_v43, 0.0  ;;  %v6020_v39 = vld [vmem:[%s6237_s29 + $0x128] sm:$0xff]   ;;  %v6021_v63 = vld [vmem:[%s6237_s29 + $0x130] sm:$0xff]  }
 0x34c   : > { %v2638_v62 = vpack.c.bf16 %v2629_v28, %v2628_v40  ;;  %5592 = vmatprep.subr.bf16.mxu0 %v2639_v41 }
 0x34e   : > { %5532 = vmatprep.mubr.msk.bf16.mxu0 %vm1866_vm2, %v2638_v62 }
 0x34f   : > { %5533 = vmatmul.mubr.msk.bf16.gmra.mxu0 %vm1866_vm2, %v2639_v41 }
 0x350   : > { %5558 = vmatprep.mubr.msk.bf16.mxu0 %vm968_vm1, %v5975_v44 }
 0x357   : > { %5559 = vmatmul.mubr.msk.bf16.vlgmr.msra.gmra.mxu0 %vm968_vm1, %v5976_v52 }
 0x358   : > { %5593 = vmatpush3.bf16.msra.mxu0 %v2639_v41  ;;  %5562 = vmatprep.mubr.msk.bf16.mxu0 %vm968_vm1, %v5977_v10 }
 0x359   : > { %5594 = vmatprep.subr.bf16.mxu0 %v2638_v62 }
 0x35c   : > { %5595 = vmatpush3.bf16.msra.mxu0 %v2638_v62  ;;  %v6022_v62 = vld [vmem:[%s6237_s29 + $0x138] sm:$0xff]  }
 0x35d   : > { %5596 = vmatprep.subr.bf16.mxu0 %v2637_v14 }
 0x35f   : > { %5563 = vmatmul.mubr.msk.bf16.gmra.mxu0 %vm968_vm1, %v5978_v51 }
 0x360   : > { %5597 = vmatpush3.bf16.msra.mxu0 %v2637_v14  ;;  %5566 = vmatprep.mubr.msk.bf16.mxu0 %vm968_vm1, %v5979_v30  ;;  %v6012_v14 = vld [vmem:[%s6237_s29 + $0xe8] sm:$0xff]  }
 0x361   : > { %5598 = vmatprep.subr.bf16.mxu0 %v2636_v56 }
 0x364   : > { %5599 = vmatpush3.bf16.msra.mxu0 %v2636_v56 }
 0x365   : > { %5600 = vmatprep.subr.bf16.mxu0 %v6639_v47 }
 0x367   : > { %5567 = vmatmul.mubr.msk.bf16.gmra.mxu0 %vm968_vm1, %v5980_v3 }
 0x368   : > { %5601 = vmatpush3.bf16.msra.mxu0 %v6639_v47  ;;  %5570 = vmatprep.mubr.msk.bf16.mxu0 %vm968_vm1, %v5981_v22  ;;  %v5992_v47 = vld [vmem:[%s6237_s29 + $0x48] sm:$0xff]  }
 0x369   : > { %5602 = vmatprep.subr.bf16.mxu0 %v6645_v20 }
 0x36c   : > { %5603 = vmatpush3.bf16.msra.mxu0 %v6645_v20  ;;  %v5997_v20 = vld [vmem:[%s6237_s29 + $0x70] sm:$0xff]  }
 0x36d   : > { %5604 = vmatprep.subr.bf16.mxu0 %v6623_v36 }
 0x36f   : > { %5571 = vmatmul.mubr.msk.bf16.gmra.mxu0 %vm968_vm1, %v5982_v13 }
 0x370   : > { %5605 = vmatpush3.bf16.msra.mxu0 %v6623_v36  ;;  %5608 = vmatprep.mubr.bf16.mxu0 %v5983_v4  ;;  %v5988_v36 = vld [vmem:[%s6237_s29 + $0x28] sm:$0xff]  }
 0x371   : > { %5606 = vmatprep.subr.bf16.mxu0 %v6625_v58 }
 0x374   : > { %5607 = vmatpush3.bf16.msra.mxu0 %v6625_v58  ;;  %v5991_v58 = vld [vmem:[%s6237_s29 + $0x40] sm:$0xff]   ;;  %s344_s29 = scalar_lea.vmem [#allocation2], %s4664_s19 }
 0x375   : > { %s4541_s20 = sshll.u32 %s344_s29, 4  ;;  %s7078_s20 = int_to_ptr.vmem [resolvable:$true] %s4541_s20 }
 0x376   : > { %s6023_s13 = scalar_lea.vmem %s7078_s20, 128  ;;  %p6030_p0 = scmp.lt.s32.totalorder %s7078_s20, %s6028_s9 }
 0x377   : > { %5609 = vmatmul.mubr.bf16.vlgmr.msra.gmra.mxu0 %v5984_v35  ;;  %p6024_p11 = scmp.ne.s32.totalorder %s7078_s20, %s6023_s13  ;;  %p6031_p1 = scmp.lt.s32.totalorder %s6029_s18, %s6023_s13 }
 0x378   : > { %5612 = vmatprep.mubr.bf16.mxu0 %v5985_v27 }
 0x379   : > { %p6025_p12 = pnand %p6024_p11, %p6166_p5  ;;  %p6032_p2 = por %p6031_p1, %p6030_p0 }
 0x37b   : > { %p6026_p13 = pneg %p6025_p12 }
 0x37d   : > { %p6033_p3 = pnand %p6032_p2, %p6026_p13 }
 0x37f   : > { %5613 = vmatmul.mubr.bf16.gmra.mxu0 %v5986_v18 }
 0x380   : > { %5616 = vmatprep.mubr.bf16.mxu0 %v5987_v19 }
 0x387   : > { %5617 = vmatmul.mubr.bf16.gmra.mxu0 %v5988_v36 }
 0x388   : > { %5620 = vmatprep.mubr.bf16.mxu0 %v5989_v29 }
 0x38f   : > { %5621 = vmatmul.mubr.bf16.gmra.mxu0 %v5990_v46 }
 0x390   : > { %5624 = vmatprep.mubr.bf16.mxu0 %v5991_v58 }
 0x397   : > { %5625 = vmatmul.mubr.bf16.gmra.mxu0 %v5992_v47 }
 0x398   : > { %5628 = vmatprep.mubr.bf16.mxu0 %v5993_v11 }
 0x39f   : > { %5629 = vmatmul.mubr.bf16.gmra.mxu0 %v5994_v5 }
 0x3a0   : > { %5632 = vmatprep.mubr.bf16.mxu0 %v5995_v54 }
 0x3a7   : > { %5633 = vmatmul.mubr.bf16.gmra.mxu0 %v5996_v60 }
 0x3a8   : > { %5636 = vmatprep.mubr.bf16.mxu0 %v5997_v20 }
 0x3af   : > { %5637 = vmatmul.mubr.bf16.gmra.mxu0 %v5998_v55 }
 0x3b0   : > { %5640 = vmatprep.mubr.bf16.mxu0 %v5999_v50 }
 0x3b7   : > { %5641 = vmatmul.mubr.bf16.gmra.mxu0 %v6000_v9 }
 0x3b8   : > { %5644 = vmatprep.mubr.bf16.mxu0 %v6001_v15 }
 0x3bf   : > { %5645 = vmatmul.mubr.bf16.gmra.mxu0 %v6002_v24  ;;  %v5967_v24 = vld [vmem:[%s7124_s6 + $0xa0] sm:$0xff]  }
 0x3c0   : > { %5648 = vmatprep.mubr.bf16.mxu0 %v6003_v26 }
 0x3c7   : > { %5649 = vmatmul.mubr.bf16.gmra.mxu0 %v6004_v12 }
 0x3c8   : > { %5652 = vmatprep.mubr.bf16.mxu0 %v6005_v7 }
 0x3cf   : > { %5653 = vmatmul.mubr.bf16.gmra.mxu0 %v6006_v2 }
 0x3d0   : > { %5656 = vmatprep.mubr.bf16.mxu0 %v6007_v32 }
 0x3d7   : > { %5657 = vmatmul.mubr.bf16.gmra.mxu0 %v6008_v31 }
 0x3d8   : > { %5660 = vmatprep.mubr.bf16.mxu0 %v6009_v48 }
 0x3df   : > { %5661 = vmatmul.mubr.bf16.gmra.mxu0 %v6010_v49 }
 0x3e0   : > { %5664 = vmatprep.mubr.bf16.mxu0 %v6011_v34 }
 0x3e7   : > { %5665 = vmatmul.mubr.bf16.gmra.mxu0 %v6012_v14 }
 0x3e8   : > { %5668 = vmatprep.mubr.bf16.mxu0 %v6013_v33 }
 0x3ef   : > { %5669 = vmatmul.mubr.bf16.gmra.mxu0 %v6014_v38 }
 0x3f0   : > { %5672 = vmatprep.mubr.bf16.mxu0 %v6015_v53 }
 0x3f7   : > { %v6738_v61 = vpop.f32.mrf.mxu0  ;;  %5673 = vmatmul.mubr.bf16.gmra.mxu0 %v6016_v45 }
 0x3f8   : > { %5676 = vmatprep.mubr.bf16.mxu0 %v6017_v0 }
 0x3f9   : > { %v6742_v42 = vpop.f32.mrf.mxu0 }
 0x3fa   : > { %7136 = vst [vmem:[#allocation5_spill] sm:$0xff] %v6742_v42 }
 0x3fb   : > { %v6744_v8 = vpop.f32.mrf.mxu0 }
 0x3fd   : > { %v6746_v56 = vpop.f32.mrf.mxu0 }
 0x3fe   : > { %7137 = vst [vmem:[#allocation6_spill] sm:$0xff] %v6746_v56 }
 0x3ff   : > { %v6748_v6 = vpop.f32.mrf.mxu0  ;;  %5677 = vmatmul.mubr.bf16.gmra.mxu0 %v6018_v57 }
 0x400   : > { %5680 = vmatprep.mubr.bf16.mxu0 %v6019_v16  ;;  %v5973_v16 = vld [vmem:[%s7124_s6 + $0x100] sm:$0xff]  }
 0x401   : > { %v6752_v59 = vpop.f32.mrf.mxu0  ;;  %5788 = vmatprep.subr.bf16.mxu0 %v5973_v16 }
 0x402   : > { %7138 = vst [vmem:[#allocation7_spill] sm:$0xff] %v6752_v59  ;;  %5789 = vmatpush3.bf16.msra.mxu0 %v5973_v16  ;;  %v5970_v16 = vld [vmem:[%s7124_s6 + $0xa8] sm:$0xff]  }
 0x403   : > { %v6754_v37 = vpop.f32.mrf.mxu0 }
 0x404   : > { %7139 = vst [vmem:[#allocation8_spill] sm:$0xff] %v6754_v37 }
 0x405   : > { %v6756_v23 = vpop.f32.mrf.mxu0 }
 0x406   : > { %7140 = vst [vmem:[#allocation9_spill] sm:$0xff] %v6756_v23 }
 0x407   : > { %v6758_v17 = vpop.f32.mrf.mxu0  ;;  %5681 = vmatmul.mubr.bf16.gmra.mxu0 %v6020_v39 }
 0x408   : > { %7141 = vst [vmem:[#allocation10_spill] sm:$0xff] %v6758_v17  ;;  %5684 = vmatprep.mubr.bf16.mxu0 %v6021_v63 }
 0x409   : > { %v6762_v43 = vpop.f32.mrf.mxu0 }
 0x40a   : > { %7142 = vst [vmem:[#allocation11_spill] sm:$0xff] %v6762_v43 }
 0x40b   : > { %v6764_v40 = vpop.f32.mrf.mxu0 }
 0x40c   : > { %7143 = vst [vmem:[#allocation12_spill] sm:$0xff] %v6764_v40 }
 0x40d   : > { %v6766_v41 = vpop.f32.mrf.mxu0 }
 0x40e   : > { %7144 = vst [vmem:[#allocation13_spill] sm:$0xff] %v6766_v41 }
 0x40f   : > { %v6768_v28 = vpop.f32.mrf.mxu0  ;;  %5685 = vmatmul.mubr.bf16.gmra.mxu0 %v6022_v62 }
 0x410   : > { %7145 = vst [vmem:[#allocation14_spill] sm:$0xff] %v6768_v28 }
 0x411   : > { %v6771_v44 = vpop.f32.mrf.mxu0 }
 0x412   : > { %7146 = vst [vmem:[#allocation15_spill] sm:$0xff] %v6771_v44 }
 0x413   : > { %v6773_v52 = vpop.f32.mrf.mxu0 }
 0x414   : > { %7147 = vst [vmem:[#allocation16_spill] sm:$0xff] %v6773_v52 }
 0x415   : > { %v6775_v10 = vpop.f32.mrf.mxu0 }
 0x416   : > { %7148 = vst [vmem:[#allocation17_spill] sm:$0xff] %v6775_v10 }
 0x417   : > { %v6777_v51 = vpop.f32.mrf.mxu0 }
 0x419   : > { %v6779_v30 = vpop.f32.mrf.mxu0 }
 0x41b   : > { %v6781_v3 = vpop.f32.mrf.mxu0 }
 0x41d   : > { %v6783_v22 = vpop.f32.mrf.mxu0 }
 0x41f   : > { %v6785_v13 = vpop.f32.mrf.mxu0 }
 0x421   : > { %v6787_v4 = vpop.f32.mrf.mxu0 }
 0x423   : > { %v6789_v35 = vpop.f32.mrf.mxu0 }
 0x425   : > { %v6791_v27 = vpop.f32.mrf.mxu0 }
 0x427   : > { %v6793_v18 = vpop.f32.mrf.mxu0 }
 0x429   : > { %v6795_v19 = vpop.f32.mrf.mxu0 }
 0x42b   : > { %v6797_v36 = vpop.f32.mrf.mxu0 }
 0x42d   : > { %v6799_v29 = vpop.f32.mrf.mxu0 }
 0x42f   : > { %v6801_v46 = vpop.f32.mrf.mxu0 }
 0x431   : > { %v6803_v58 = vpop.f32.mrf.mxu0 }
 0x433   : > { %v6805_v47 = vpop.f32.mrf.mxu0 }
 0x435   : > { %v6807_v11 = vpop.f32.mrf.mxu0 }
 0x437   : > { %v5610_v5 = vpop.f32.mrf.mxu0 }
 0x439   : > { %v3154_v54 = vpop.f32.mrf.mxu0 }
 0x43b   : > { %v5611_v1 = vpop.f32.mrf.mxu0 }
 0x43c   : > { %v3474_v55 = vpack.c.bf16 %v5611_v1, %v5610_v5  ;;  %v5968_v1 = vld [vmem:[%s7124_s6 + $0x98] sm:$0xff]  }
 0x43d   : > { %v3157_v60 = vpop.f32.mrf.mxu0 }
 0x43e   : > { %v3473_v20 = vpack.c.bf16 %v3157_v60, %v3154_v54 }
 0x43f   : > { %v5614_v50 = vpop.f32.mrf.mxu0 }
 0x440   : > { %5692 = vmatprep.mubr.msk.bf16.mxu1 %vm1866_vm2, %v3473_v20 }
 0x441   : > { %v3170_v9 = vpop.f32.mrf.mxu0  ;;  %5693 = vmatmul.mubr.msk.bf16.vlgmr.msra.gmra.mxu1 %vm1866_vm2, %v3474_v55  ;;  %v5969_v55 = vld [vmem:[%s7124_s6 + $0xb0] sm:$0xff]  }
 0x442   : > { %5709 = vmatpush3.bf16.msra.mxu1 %v6723_v25 }
 0x443   : > { %v5615_v15 = vpop.f32.mrf.mxu0  ;;  %5710 = vmatprep.subr.bf16.mxu1 %v5966_v21 }
 0x444   : > { %v3476_v7 = vpack.c.bf16 %v5615_v15, %v5614_v50 }
 0x445   : > { %v3173_v26 = vpop.f32.mrf.mxu0 }
 0x446   : > { %v3475_v12 = vpack.c.bf16 %v3173_v26, %v3170_v9  ;;  %5711 = vmatpush3.bf16.msra.mxu1 %v5966_v21 }
 0x447   : > { %v5618_v2 = vpop.f32.mrf.mxu0  ;;  %5728 = vmatprep.subr.bf16.mxu1 %v5967_v24 }
 0x448   : > { %5696 = vmatprep.mubr.msk.bf16.mxu1 %vm1866_vm2, %v3475_v12 }
 0x449   : > { %v3186_v32 = vpop.f32.mrf.mxu0  ;;  %5697 = vmatmul.mubr.msk.bf16.gmra.mxu1 %vm1866_vm2, %v3476_v7 }
 0x44b   : > { %v5619_v31 = vpop.f32.mrf.mxu0 }
 0x44c   : > { %v3478_v49 = vpack.c.bf16 %v5619_v31, %v5618_v2 }
 0x44d   : > { %v3189_v48 = vpop.f32.mrf.mxu0 }
 0x44e   : > { %v3477_v25 = vpack.c.bf16 %v3189_v48, %v3186_v32 }
 0x44f   : > { %v5622_v34 = vpop.f32.mrf.mxu0 }
 0x450   : > { %5700 = vmatprep.mubr.msk.bf16.mxu1 %vm1866_vm2, %v3477_v25 }
 0x451   : > { %v3202_v14 = vpop.f32.mrf.mxu0  ;;  %5701 = vmatmul.mubr.msk.bf16.gmra.mxu1 %vm1866_vm2, %v3478_v49 }
 0x453   : > { %v5623_v33 = vpop.f32.mrf.mxu0 }
 0x454   : > { %v3480_v45 = vpack.c.bf16 %v5623_v33, %v5622_v34 }
 0x455   : > { %v3205_v38 = vpop.f32.mrf.mxu0 }
 0x456   : > { %v3479_v53 = vpack.c.bf16 %v3205_v38, %v3202_v14 }
 0x457   : > { %v5626_v0 = vpop.f32.mrf.mxu0 }
 0x458   : > { %5704 = vmatprep.mubr.msk.bf16.mxu1 %vm1866_vm2, %v3479_v53 }
 0x459   : > { %v3218_v57 = vpop.f32.mrf.mxu0  ;;  %5705 = vmatmul.mubr.msk.bf16.gmra.mxu1 %vm1866_vm2, %v3480_v45 }
 0x45b   : > { %v5627_v39 = vpop.f32.mrf.mxu0 }
 0x45c   : > { %v3482_v5 = vpack.c.bf16 %v5627_v39, %v5626_v0 }
 0x45d   : > { %v3221_v63 = vpop.f32.mrf.mxu0 }
 0x45e   : > { %v3481_v62 = vpack.c.bf16 %v3221_v63, %v3218_v57  ;;  %v6846_v63 = vpop.f32.mrf.mxu1 }
 0x45f   : > { %v5630_v54 = vpop.f32.mrf.mxu0 }
 0x460   : > { %5712 = vmatprep.mubr.msk.bf16.mxu1 %vm1866_vm2, %v3481_v62 }
 0x461   : > { %v3234_v60 = vpop.f32.mrf.mxu0  ;;  %5713 = vmatmul.mubr.msk.bf16.vlgmr.msra.gmra.mxu1 %vm1866_vm2, %v3482_v5  ;;  %v5971_v5 = vld [vmem:[%s7124_s6 + $0xc0] sm:$0xff]  }
 0x462   : > { %5729 = vmatpush3.bf16.msra.mxu1 %v5967_v24 }
 0x463   : > { %v5631_v20 = vpop.f32.mrf.mxu0  ;;  %5730 = vmatprep.subr.bf16.mxu1 %v5968_v1 }
 0x464   : > { %v3484_v9 = vpack.c.bf16 %v5631_v20, %v5630_v54 }
 0x465   : > { %v3237_v50 = vpop.f32.mrf.mxu0 }
 0x466   : > { %v3483_v21 = vpack.c.bf16 %v3237_v50, %v3234_v60  ;;  %5731 = vmatpush3.bf16.msra.mxu1 %v5968_v1  ;;  %v6851_v60 = vpop.f32.mrf.mxu1 }
 0x467   : > { %v5634_v15 = vpop.f32.mrf.mxu0  ;;  %5748 = vmatprep.subr.bf16.mxu1 %v5969_v55  ;;  %7149 = vst [vmem:[#allocation18_spill] sm:$0xff] %v6851_v60 }
 0x468   : > { %5716 = vmatprep.mubr.msk.bf16.mxu1 %vm1866_vm2, %v3483_v21 }
 0x469   : > { %v3250_v26 = vpop.f32.mrf.mxu0  ;;  %5717 = vmatmul.mubr.msk.bf16.gmra.mxu1 %vm1866_vm2, %v3484_v9 }
 0x46b   : > { %v5635_v12 = vpop.f32.mrf.mxu0 }
 0x46c   : > { %v3486_v2 = vpack.c.bf16 %v5635_v12, %v5634_v15 }
 0x46d   : > { %v3253_v7 = vpop.f32.mrf.mxu0 }
 0x46e   : > { %v3485_v24 = vpack.c.bf16 %v3253_v7, %v3250_v26 }
 0x46f   : > { %v5638_v32 = vpop.f32.mrf.mxu0 }
 0x470   : > { %5720 = vmatprep.mubr.msk.bf16.mxu1 %vm1866_vm2, %v3485_v24 }
 0x471   : > { %v3266_v31 = vpop.f32.mrf.mxu0  ;;  %5721 = vmatmul.mubr.msk.bf16.gmra.mxu1 %vm1866_vm2, %v3486_v2 }
 0x473   : > { %v5639_v48 = vpop.f32.mrf.mxu0 }
 0x474   : > { %v3488_v34 = vpack.c.bf16 %v5639_v48, %v5638_v32 }
 0x475   : > { %v3269_v25 = vpop.f32.mrf.mxu0 }
 0x476   : > { %v3487_v49 = vpack.c.bf16 %v3269_v25, %v3266_v31 }
 0x477   : > { %v5642_v14 = vpop.f32.mrf.mxu0 }
 0x478   : > { %5724 = vmatprep.mubr.msk.bf16.mxu1 %vm1866_vm2, %v3487_v49 }
 0x479   : > { %v3282_v33 = vpop.f32.mrf.mxu0  ;;  %5725 = vmatmul.mubr.msk.bf16.gmra.mxu1 %vm1866_vm2, %v3488_v34 }
 0x47b   : > { %v5643_v38 = vpop.f32.mrf.mxu0 }
 0x47c   : > { %v3490_v0 = vpack.c.bf16 %v5643_v38, %v5642_v14 }
 0x47d   : > { %v3285_v53 = vpop.f32.mrf.mxu0 }
 0x47e   : > { %v3489_v45 = vpack.c.bf16 %v3285_v53, %v3282_v33 }
 0x47f   : > { %v5646_v57 = vpop.f32.mrf.mxu0 }
 0x480   : > { %5732 = vmatprep.mubr.msk.bf16.mxu1 %vm1866_vm2, %v3489_v45 }
 0x481   : > { %v3298_v39 = vpop.f32.mrf.mxu0  ;;  %5733 = vmatmul.mubr.msk.bf16.vlgmr.msra.gmra.mxu1 %vm1866_vm2, %v3490_v0 }
 0x482   : > { %5749 = vmatpush3.bf16.msra.mxu1 %v5969_v55  ;;  %v6855_v55 = vpop.f32.mrf.mxu1 }
 0x483   : > { %v5647_v62 = vpop.f32.mrf.mxu0  ;;  %5750 = vmatprep.subr.bf16.mxu1 %v5970_v16 }
 0x484   : > { %v3492_v20 = vpack.c.bf16 %v5647_v62, %v5646_v57  ;;  %v6857_v12 = vpop.f32.mrf.mxu1  ;;  %v5972_v62 = vld [vmem:[%s7124_s6 + $0xb8] sm:$0xff]  }
 0x485   : > { %v3301_v54 = vpop.f32.mrf.mxu0  ;;  %7150 = vst [vmem:[#allocation19_spill] sm:$0xff] %v6857_v12 }
 0x486   : > { %v3491_v1 = vpack.c.bf16 %v3301_v54, %v3298_v39  ;;  %5751 = vmatpush3.bf16.msra.mxu1 %v5970_v16  ;;  %v6861_v32 = vpop.f32.mrf.mxu1 }
 0x487   : > { %v5650_v50 = vpop.f32.mrf.mxu0  ;;  %5768 = vmatprep.subr.bf16.mxu1 %v5971_v5  ;;  %7151 = vst [vmem:[#allocation20_spill] sm:$0xff] %v6861_v32 }
 0x488   : > { %5736 = vmatprep.mubr.msk.bf16.mxu1 %vm1866_vm2, %v3491_v1  ;;  %v6863_v49 = vpop.f32.mrf.mxu1 }
 0x489   : > { %v3314_v21 = vpop.f32.mrf.mxu0  ;;  %5737 = vmatmul.mubr.msk.bf16.gmra.mxu1 %vm1866_vm2, %v3492_v20  ;;  %7152 = vst [vmem:[#allocation21_spill] sm:$0xff] %v6863_v49 }
 0x48a   : > { %v6867_v38 = vpop.f32.mrf.mxu1 }
 0x48b   : > { %v5651_v9 = vpop.f32.mrf.mxu0  ;;  %7153 = vst [vmem:[#allocation22_spill] sm:$0xff] %v6867_v38 }
 0x48c   : > { %v3494_v7 = vpack.c.bf16 %v5651_v9, %v5650_v50  ;;  %v6869_v57 = vpop.f32.mrf.mxu1 }
 0x48d   : > { %v3317_v15 = vpop.f32.mrf.mxu0  ;;  %7154 = vst [vmem:[#allocation23_spill] sm:$0xff] %v6869_v57 }
 0x48e   : > { %v3493_v26 = vpack.c.bf16 %v3317_v15, %v3314_v21  ;;  %v6876_v1 = vpop.f32.mrf.mxu1 }
 0x48f   : > { %v5654_v24 = vpop.f32.mrf.mxu0  ;;  %7155 = vst [vmem:[#allocation24_spill] sm:$0xff] %v6876_v1 }
 0x490   : > { %5740 = vmatprep.mubr.msk.bf16.mxu1 %vm1866_vm2, %v3493_v26  ;;  %v6878_v9 = vpop.f32.mrf.mxu1 }
 0x491   : > { %v3330_v2 = vpop.f32.mrf.mxu0  ;;  %5741 = vmatmul.mubr.msk.bf16.gmra.mxu1 %vm1866_vm2, %v3494_v7  ;;  %7156 = vst [vmem:[#allocation25_spill] sm:$0xff] %v6878_v9 }
 0x493   : > { %v5655_v31 = vpop.f32.mrf.mxu0 }
 0x494   : > { %v3496_v34 = vpack.c.bf16 %v5655_v31, %v5654_v24  ;;  %v6882_v24 = vpop.f32.mrf.mxu1 }
 0x495   : > { %v3333_v48 = vpop.f32.mrf.mxu0  ;;  %7157 = vst [vmem:[#allocation26_spill] sm:$0xff] %v6882_v24 }
 0x496   : > { %v3495_v25 = vpack.c.bf16 %v3333_v48, %v3330_v2  ;;  %v6884_v48 = vpop.f32.mrf.mxu1 }
 0x497   : > { %v5658_v14 = vpop.f32.mrf.mxu0  ;;  %7158 = vst [vmem:[#allocation27_spill] sm:$0xff] %v6884_v48 }
 0x498   : > { %5744 = vmatprep.mubr.msk.bf16.mxu1 %vm1866_vm2, %v3495_v25 }
 0x499   : > { %v3346_v33 = vpop.f32.mrf.mxu0  ;;  %5745 = vmatmul.mubr.msk.bf16.gmra.mxu1 %vm1866_vm2, %v3496_v34 }
 0x49b   : > { %v5659_v53 = vpop.f32.mrf.mxu0 }
 0x49c   : > { %v3498_v16 = vpack.c.bf16 %v5659_v53, %v5658_v14 }
 0x49d   : > { %v3349_v45 = vpop.f32.mrf.mxu0 }
 0x49e   : > { %v3497_v0 = vpack.c.bf16 %v3349_v45, %v3346_v33  ;;  %v6888_v33 = vpop.f32.mrf.mxu1 }
 0x49f   : > { %v5662_v39 = vpop.f32.mrf.mxu0  ;;  %7159 = vst [vmem:[#allocation28_spill] sm:$0xff] %v6888_v33 }
 0x4a0   : > { %5752 = vmatprep.mubr.msk.bf16.mxu1 %vm1866_vm2, %v3497_v0 }
 0x4a1   : > { %v3362_v54 = vpop.f32.mrf.mxu0  ;;  %5753 = vmatmul.mubr.msk.bf16.vlgmr.msra.gmra.mxu1 %vm1866_vm2, %v3498_v16  ;;  %v6890_v16 = vpop.f32.mrf.mxu1 }
 0x4a2   : > { %5769 = vmatpush3.bf16.msra.mxu1 %v5971_v5  ;;  %7160 = vst [vmem:[#allocation29_spill] sm:$0xff] %v6890_v16 }
 0x4a3   : > { %v5663_v20 = vpop.f32.mrf.mxu0  ;;  %5770 = vmatprep.subr.bf16.mxu1 %v5972_v62 }
 0x4a4   : > { %v3500_v15 = vpack.c.bf16 %v5663_v20, %v5662_v39  ;;  %v6894_v20 = vpop.f32.mrf.mxu1 }
 0x4a5   : > { %v3365_v50 = vpop.f32.mrf.mxu0  ;;  %7161 = vst [vmem:[#allocation30_spill] sm:$0xff] %v6894_v20 }
 0x4a6   : > { %v3499_v21 = vpack.c.bf16 %v3365_v50, %v3362_v54  ;;  %5771 = vmatpush3.bf16.msra.mxu1 %v5972_v62 }
 0x4a7   : > { %v5666_v26 = vpop.f32.mrf.mxu0 }
 0x4a8   : > { %5756 = vmatprep.mubr.msk.bf16.mxu1 %vm1866_vm2, %v3499_v21 }
 0x4a9   : > { %v3378_v7 = vpop.f32.mrf.mxu0  ;;  %5757 = vmatmul.mubr.msk.bf16.gmra.mxu1 %vm1866_vm2, %v3500_v15 }
 0x4ab   : > { %v5667_v2 = vpop.f32.mrf.mxu0 }
 0x4ac   : > { %v3502_v25 = vpack.c.bf16 %v5667_v2, %v5666_v26  ;;  %v6896_v26 = vpop.f32.mrf.mxu1 }
 0x4ad   : > { %v3381_v5 = vpop.f32.mrf.mxu0  ;;  %7162 = vst [vmem:[#allocation31_spill] sm:$0xff] %v6896_v26 }
 0x4ae   : > { %v3501_v31 = vpack.c.bf16 %v3381_v5, %v3378_v7  ;;  %v5974_v5 = vld [vmem:[%s7124_s6 + $0xf8] sm:$0xff]  }
 0x4af   : > { %v5670_v34 = vpop.f32.mrf.mxu0  ;;  %5790 = vmatprep.subr.bf16.mxu0 %v5974_v5 }
 0x4b0   : > { %5760 = vmatprep.mubr.msk.bf16.mxu1 %vm1866_vm2, %v3501_v31  ;;  %5791 = vmatpush3.bf16.msra.mxu0 %v5974_v5 }
 0x4b1   : > { %v3394_v14 = vpop.f32.mrf.mxu0  ;;  %5761 = vmatmul.mubr.msk.bf16.gmra.mxu1 %vm1866_vm2, %v3502_v25  ;;  %v5578_v25 = vpop.f32.mrf.mxu1 }
 0x4b2   : > { %v3066_v57 = vadd.f32 %v5578_v25, %v6777_v51 }
 0x4b3   : > { %v5671_v53 = vpop.f32.mrf.mxu0 }
 0x4b4   : > { %v3504_v39 = vpack.c.bf16 %v5671_v53, %v5670_v34 }
 0x4b5   : > { %v3397_v45 = vpop.f32.mrf.mxu0 }
 0x4b6   : > { %v3503_v0 = vpack.c.bf16 %v3397_v45, %v3394_v14  ;;  %v3057_v45 = vpop.f32.mrf.mxu1 }
 0x4b7   : > { %v5674_v62 = vpop.f32.mrf.mxu0 }
 0x4b8   : > { %5764 = vmatprep.mubr.msk.bf16.mxu1 %vm1866_vm2, %v3503_v0 }
 0x4b9   : > { %v3410_v54 = vpop.f32.mrf.mxu0  ;;  %5765 = vmatmul.mubr.msk.bf16.gmra.mxu1 %vm1866_vm2, %v3504_v39 }
 0x4bb   : > { %v5675_v50 = vpop.f32.mrf.mxu0 }
 0x4bc   : > { %v3506_v7 = vpack.c.bf16 %v5675_v50, %v5674_v62 }
 0x4bd   : > { %v3413_v21 = vpop.f32.mrf.mxu0 }
 0x4be   : > { %v3505_v15 = vpack.c.bf16 %v3413_v21, %v3410_v54  ;;  %v5579_v54 = vpop.f32.mrf.mxu1 }
 0x4bf   : > { %v5678_v2 = vpop.f32.mrf.mxu0 }
 0x4c0   : > { %5772 = vmatprep.mubr.msk.bf16.mxu1 %vm1866_vm2, %v3505_v15  ;;  %v3060_v60 = vpop.f32.mrf.mxu1 }
 0x4c1   : > { %v3426_v31 = vpop.f32.mrf.mxu0  ;;  %5773 = vmatmul.mubr.msk.bf16.vlgmr.msra.gmra.mxu1 %vm1866_vm2, %v3506_v7  ;;  %v3061_v9 = vadd.f32 %v3060_v60, %v6783_v22 }
 0x4c3   : > { %v5679_v34 = vpop.f32.mrf.mxu0 }
 0x4c4   : > { %v3508_v0 = vpack.c.bf16 %v5679_v34, %v5678_v2 }
 0x4c5   : > { %v3429_v14 = vpop.f32.mrf.mxu0 }
 0x4c6   : > { %v3507_v53 = vpack.c.bf16 %v3429_v14, %v3426_v31  ;;  %v5582_v31 = vpop.f32.mrf.mxu1 }
 0x4c7   : > { %v5682_v39 = vpop.f32.mrf.mxu0  ;;  %v3082_v41 = vadd.f32 %v5582_v31, %v6785_v13 }
 0x4c8   : > { %5776 = vmatprep.mubr.msk.bf16.mxu1 %vm1866_vm2, %v3507_v53  ;;  %v3073_v53 = vpop.f32.mrf.mxu1 }
 0x4c9   : > { %v3442_v62 = vpop.f32.mrf.mxu0  ;;  %5777 = vmatmul.mubr.msk.bf16.gmra.mxu1 %vm1866_vm2, %v3508_v0  ;;  %v3074_v16 = vadd.f32 %v3073_v53, %v6787_v4 }
 0x4ca   : > { %v5583_v0 = vpop.f32.mrf.mxu1 }
 0x4cb   : > { %v5683_v50 = vpop.f32.mrf.mxu0 }
 0x4cc   : > { %v3510_v7 = vpack.c.bf16 %v5683_v50, %v5682_v39 }
 0x4cd   : > { %v3445_v21 = vpop.f32.mrf.mxu0 }
 0x4ce   : > { %v3509_v15 = vpack.c.bf16 %v3445_v21, %v3442_v62  ;;  %v3076_v62 = vpop.f32.mrf.mxu1 }
 0x4cf   : > { %v5686_v42 = vpop.f32.mrf.mxu0 }
 0x4d0   : > { %5780 = vmatprep.mubr.msk.bf16.mxu1 %vm1866_vm2, %v3509_v15  ;;  %v5586_v21 = vpop.f32.mrf.mxu1 }
 0x4d1   : > { %v3458_v5 = vpop.f32.mrf.mxu0  ;;  %5781 = vmatmul.mubr.msk.bf16.gmra.mxu1 %vm1866_vm2, %v3510_v7  ;;  %v3098_v22 = vadd.f32 %v5586_v21, %v6793_v18 }
 0x4d2   : > { %v3089_v39 = vpop.f32.mrf.mxu1 }
 0x4d3   : > { %v5687_v2 = vpop.f32.mrf.mxu0  ;;  %v3090_v13 = vadd.f32 %v3089_v39, %v6795_v19 }
 0x4d4   : > { %v3512_v12 = vpack.c.bf16 %v5687_v2, %v5686_v42  ;;  %v5587_v50 = vpop.f32.mrf.mxu1 }
 0x4d5   : > { %v3461_v34 = vpop.f32.mrf.mxu0  ;;  %v3101_v4 = vadd.f32 %v5587_v50, %v6797_v36 }
 0x4d6   : > { %v3511_v14 = vpack.c.bf16 %v3461_v34, %v3458_v5  ;;  %v3092_v56 = vpop.f32.mrf.mxu1  ;;  %v3058_v5 = vadd.f32 %v3057_v45, %v6779_v30  ;;  %v3069_v34 = vadd.f32 %v5579_v54, %v6781_v3  ;;  %v3085_v30 = vadd.f32 %v5583_v0, %v6789_v35 }
 0x4d7   : > { %v3077_v3 = vadd.f32 %v3076_v62, %v6791_v27  ;;  %v3093_v35 = vadd.f32 %v3092_v56, %v6799_v29 }
 0x4d8   : > { %5784 = vmatprep.mubr.msk.bf16.mxu1 %vm1866_vm2, %v3511_v14  ;;  %v5590_v15 = vpop.f32.mrf.mxu1 }
 0x4d9   : > { %5785 = vmatmul.mubr.msk.bf16.gmra.mxu1 %vm1866_vm2, %v3512_v12  ;;  %v3114_v27 = vadd.f32 %v5590_v15, %v6801_v46 }
 0x4da   : > { %v3105_v49 = vpop.f32.mrf.mxu1 }
 0x4db   : > { %v3106_v18 = vadd.f32 %v3105_v49, %v6803_v58 }
 0x4dc   : > { %v5591_v59 = vpop.f32.mrf.mxu1 }
 0x4dd   : > { %v3117_v19 = vadd.f32 %v5591_v59, %v6805_v47 }
 0x4de   : > { %v3108_v7 = vpop.f32.mrf.mxu1 }
 0x4df   : > { %v3109_v36 = vadd.f32 %v3108_v7, %v6807_v11 }
 0x501   : > { %v5694_v23 = vpop.f32.mrf.mxu1 }
 0x502   : > { %v3652_v42 = vadd.f32 %v5694_v23, %v3066_v57 }
 0x503   : > { %v3587_v2 = vpop.f32.mrf.mxu1 }
 0x504   : > { %v3650_v12 = vadd.f32 %v3587_v2, %v3058_v5 }
 0x505   : > { %v5695_v14 = vpop.f32.mrf.mxu1 }
 0x506   : > { %v3653_v43 = vadd.f32 %v5695_v14, %v3069_v34 }
 0x507   : > { %v3590_v48 = vpop.f32.mrf.mxu1 }
 0x508   : > { %v3651_v26 = vadd.f32 %v3590_v48, %v3061_v9 }
 0x509   : > { %v5698_v10 = vpop.f32.mrf.mxu1 }
 0x50a   : > { %v3656_v51 = vadd.f32 %v5698_v10, %v3082_v41 }
 0x50b   : > { %v3603_v25 = vpop.f32.mrf.mxu1 }
 0x50c   : > { %v3654_v23 = vadd.f32 %v3603_v25, %v3074_v16 }
 0x50d   : > { %v5699_v57 = vpop.f32.mrf.mxu1 }
 0x50e   : > { %v3657_v45 = vadd.f32 %v5699_v57, %v3085_v30 }
 0x50f   : > { %v3606_v54 = vpop.f32.mrf.mxu1 }
 0x510   : > { %v3655_v60 = vadd.f32 %v3606_v54, %v3077_v3 }
 0x511   : > { %v5702_v5 = vpop.f32.mrf.mxu1 }
 0x512   : > { %v3660_v9 = vadd.f32 %v5702_v5, %v3098_v22 }
 0x513   : > { %v3619_v48 = vpop.f32.mrf.mxu1 }
 0x514   : > { %v3658_v41 = vadd.f32 %v3619_v48, %v3090_v13 }
 0x515   : > { %v5703_v10 = vpop.f32.mrf.mxu1 }
 0x516   : > { %v3661_v16 = vadd.f32 %v5703_v10, %v3101_v4 }
 0x517   : > { %v3622_v31 = vpop.f32.mrf.mxu1 }
 0x518   : > { %v3659_v53 = vadd.f32 %v3622_v31, %v3093_v35 }
 0x519   : > { %v5706_v0 = vpop.f32.mrf.mxu1 }
 0x51a   : > { %v3664_v62 = vadd.f32 %v5706_v0, %v3114_v27 }
 0x51b   : > { %v3635_v21 = vpop.f32.mrf.mxu1 }
 0x51c   : > { %v3662_v39 = vadd.f32 %v3635_v21, %v3106_v18 }
 0x51d   : > { %v5707_v2 = vpop.f32.mrf.mxu1 }
 0x51e   : > { %v3665_v50 = vadd.f32 %v5707_v2, %v3117_v19 }
 0x51f   : > { %v3638_v34 = vpop.f32.mrf.mxu1 }
 0x520   : > { %v3663_v14 = vadd.f32 %v3638_v34, %v3109_v36 }
 0x521   : > { %v5714_v56 = vpop.f32.mrf.mxu1 }
 0x522   : > { %v3805_v29 = vadd.f32 %v5714_v56, %v3652_v42 }
 0x523   : > { %v3740_v25 = vpop.f32.mrf.mxu1 }
 0x524   : > { %v3803_v30 = vadd.f32 %v3740_v25, %v3650_v12 }
 0x525   : > { %v5715_v46 = vpop.f32.mrf.mxu1 }
 0x526   : > { %v6925_v15 = vadd.f32 %v5715_v46, %v3653_v43 }
 0x527   : > { %v3743_v57 = vpop.f32.mrf.mxu1 }
 0x528   : > { %v6927_v58 = vadd.f32 %v3743_v57, %v3651_v26 }
 0x529   : > { %v5718_v49 = vpop.f32.mrf.mxu1 }
 0x52a   : > { %v3809_v3 = vadd.f32 %v5718_v49, %v3656_v51 }
 0x52b   : > { %v3756_v59 = vpop.f32.mrf.mxu1 }
 0x52c   : > { %v3807_v47 = vadd.f32 %v3756_v59, %v3654_v23 }
 0x52d   : > { %v5719_v54 = vpop.f32.mrf.mxu1 }
 0x52e   : > { %v6929_v22 = vadd.f32 %v5719_v54, %v3657_v45 }
 0x52f   : > { %v3759_v11 = vpop.f32.mrf.mxu1 }
 0x530   : > { %v6931_v7 = vadd.f32 %v3759_v11, %v3655_v60 }
 0x531   : > { %v5722_v5 = vpop.f32.mrf.mxu1 }
 0x532   : > { %v3813_v42 = vadd.f32 %v5722_v5, %v3660_v9 }
 0x533   : > { %v3772_v13 = vpop.f32.mrf.mxu1 }
 0x534   : > { %v3811_v12 = vadd.f32 %v3772_v13, %v3658_v41 }
 0x535   : > { %v5723_v48 = vpop.f32.mrf.mxu1 }
 0x536   : > { %v6933_v43 = vadd.f32 %v5723_v48, %v3661_v16 }
 0x537   : > { %v3775_v4 = vpop.f32.mrf.mxu1 }
 0x538   : > { %v6935_v26 = vadd.f32 %v3775_v4, %v3659_v53 }
 0x539   : > { %v5726_v10 = vpop.f32.mrf.mxu1 }
 0x53a   : > { %v3817_v51 = vadd.f32 %v5726_v10, %v3664_v62 }
 0x53b   : > { %v3788_v35 = vpop.f32.mrf.mxu1 }
 0x53c   : > { %v3815_v23 = vadd.f32 %v3788_v35, %v3662_v39 }
 0x53d   : > { %v5727_v31 = vpop.f32.mrf.mxu1 }
 0x53e   : > { %v6937_v45 = vadd.f32 %v5727_v31, %v3665_v50 }
 0x53f   : > { %v3791_v27 = vpop.f32.mrf.mxu1 }
 0x540   : > { %v6939_v60 = vadd.f32 %v3791_v27, %v3663_v14 }
 0x541   : > { %v5734_v0 = vpop.f32.mrf.mxu1 }
 0x542   : > { %v3958_v9 = vadd.f32 %v5734_v0, %v3805_v29 }
 0x543   : > { %v3893_v18 = vpop.f32.mrf.mxu1 }
 0x544   : > { %v3956_v41 = vadd.f32 %v3893_v18, %v3803_v30 }
 0x545   : > { %v5735_v21 = vpop.f32.mrf.mxu1 }
 0x547   : > { %v3896_v16 = vpop.f32.mrf.mxu1 }
 0x549   : > { %v5738_v19 = vpop.f32.mrf.mxu1 }
 0x54a   : > { %v3962_v2 = vadd.f32 %v5738_v19, %v3809_v3  ;;  %v3959_v19 = vadd.f32 %v5735_v21, %v6925_v15 }
 0x54b   : > { %v3909_v53 = vpop.f32.mrf.mxu1 }
 0x54c   : > { %v3960_v36 = vadd.f32 %v3909_v53, %v3807_v47 }
 0x54d   : > { %v5739_v34 = vpop.f32.mrf.mxu1 }
 0x54e   : > { %v3963_v38 = vadd.f32 %v5739_v34, %v6929_v22 }
 0x54f   : > { %v3912_v62 = vpop.f32.mrf.mxu1 }
 0x551   : > { %v5742_v56 = vpop.f32.mrf.mxu1 }
 0x552   : > { %v6941_v39 = vadd.f32 %v5742_v56, %v3813_v42 }
 0x553   : > { %v3925_v50 = vpop.f32.mrf.mxu1 }
 0x554   : > { %v6943_v25 = vadd.f32 %v3925_v50, %v3811_v12  ;;  %v3957_v50 = vadd.f32 %v3896_v16, %v6927_v58  ;;  %v3961_v58 = vadd.f32 %v3912_v62, %v6931_v7 }
 0x555   : > { %v5743_v14 = vpop.f32.mrf.mxu1 }
 0x557   : > { %v6945_v46 = vpop.f32.mrf.mxu1 }
 0x559   : > { %v5746_v29 = vpop.f32.mrf.mxu1 }
 0x55a   : > { %v6947_v57 = vadd.f32 %v5746_v29, %v3817_v51 }
 0x55b   : > { %v3941_v30 = vpop.f32.mrf.mxu1 }
 0x55c   : > { %v6949_v49 = vadd.f32 %v3941_v30, %v3815_v23 }
 0x55d   : > { %v6951_v3 = vpop.f32.mrf.mxu1 }
 0x55f   : > { %v6953_v59 = vpop.f32.mrf.mxu1 }
 0x561   : > { %v5754_v47 = vpop.f32.mrf.mxu1 }
 0x562   : > { %v4111_v53 = vadd.f32 %v5754_v47, %v3958_v9 }
 0x563   : > { %v4046_v54 = vpop.f32.mrf.mxu1 }
 0x564   : > { %v4109_v29 = vadd.f32 %v4046_v54, %v3956_v41 }
 0x565   : > { %v5755_v11 = vpop.f32.mrf.mxu1 }
 0x566   : > { %v4112_v30 = vadd.f32 %v5755_v11, %v3959_v19  ;;  %v3969_v19 = vadd.f32 %v6953_v59, %v6939_v60 }
 0x567   : > { %v4049_v5 = vpop.f32.mrf.mxu1 }
 0x568   : > { %v4110_v52 = vadd.f32 %v4049_v5, %v3957_v50 }
 0x569   : > { %v5758_v42 = vpop.f32.mrf.mxu1 }
 0x56a   : > { %v4115_v32 = vadd.f32 %v5758_v42, %v3962_v2 }
 0x56b   : > { %v4062_v13 = vpop.f32.mrf.mxu1 }
 0x56c   : > { %v4113_v16 = vadd.f32 %v4062_v13, %v3960_v36 }
 0x56d   : > { %v5759_v12 = vpop.f32.mrf.mxu1 }
 0x56e   : > { %v4116_v47 = vadd.f32 %v5759_v12, %v3963_v38 }
 0x56f   : > { %v4065_v48 = vpop.f32.mrf.mxu1 }
 0x571   : > { %v5762_v4 = vpop.f32.mrf.mxu1 }
 0x573   : > { %v4078_v10 = vpop.f32.mrf.mxu1 }
 0x574   : > { %v4117_v2 = vadd.f32 %v4078_v10, %v6943_v25 }
 0x575   : > { %v5763_v35 = vpop.f32.mrf.mxu1 }
 0x577   : > { %v4081_v51 = vpop.f32.mrf.mxu1 }
 0x579   : > { %v6955_v31 = vpop.f32.mrf.mxu1 }
 0x57a   : > { %v4123_v25 = vadd.f32 %v6955_v31, %v6947_v57 }
 0x57b   : > { %v6957_v23 = vpop.f32.mrf.mxu1 }
 0x57d   : > { %v6959_v27 = vpop.f32.mrf.mxu1 }
 0x57f   : > { %v6961_v0 = vpop.f32.mrf.mxu1 }
 0x581   : > { %v5774_v18 = vpop.f32.mrf.mxu1 }
 0x582   : > { %v4264_v44 = vadd.f32 %v5774_v18, %v4111_v53 }
 0x583   : > { %v4199_v56 = vpop.f32.mrf.mxu1 }
 0x584   : > { %v4262_v33 = vadd.f32 %v4199_v56, %v4109_v29  ;;  %v4280_v40 = vmax.f32 %v4264_v44, 0.0  ;;  %v4121_v56 = vadd.f32 %v6957_v23, %v6949_v49 }
 0x585   : > { %v5775_v20 = vpop.f32.mrf.mxu1 }
 0x586   : > { %v4265_v28 = vadd.f32 %v5775_v20, %v4112_v30  ;;  %v4278_v15 = vmax.f32 %v4262_v33, 0.0  ;;  %v4114_v20 = vadd.f32 %v4065_v48, %v3961_v58  ;;  %v4119_v33 = vadd.f32 %v5762_v4, %v6941_v39 }
 0x587   : > { %v4202_v24 = vpop.f32.mrf.mxu1 }
 0x588   : > { %v4281_v1 = vmax.f32 %v4265_v28, 0.0  ;;  %v4263_v17 = vadd.f32 %v4202_v24, %v4110_v52 }
 0x589   : > { %v5778_v37 = vpop.f32.mrf.mxu1 }
 0x58a   : > { %v4295_v9 = vpack.c.bf16 %v4281_v1, %v4280_v40  ;;  %v4279_v21 = vmax.f32 %v4263_v17, 0.0  ;;  %v4268_v11 = vadd.f32 %v5778_v37, %v4115_v32  ;;  %v3967_v17 = vadd.f32 %v5743_v14, %v6933_v43 }
 0x58b   : > { %v4215_v41 = vpop.f32.mrf.mxu1  ;;  %v3965_v32 = vadd.f32 %v6945_v46, %v6935_v26  ;;  %v3971_v26 = vadd.f32 %v6951_v3, %v6937_v45  ;;  %v4122_v45 = vadd.f32 %v6961_v0, %v3969_v19  ;;  %v4457_v0 = vlaneseq }
 0x58c   : > { %v4294_v54 = vpack.c.bf16 %v4279_v21, %v4278_v15  ;;  %v4266_v18 = vadd.f32 %v4215_v41, %v4113_v16  ;;  %v4284_v52 = vmax.f32 %v4268_v11, 0.0  ;;  %v4120_v36 = vadd.f32 %v5763_v35, %v3967_v17  ;;  %v4455_v16 = vld [vmem:[%s7124_s6 + $0x108] sm:$0x1] }
 0x58d   : > { %v5779_v5 = vpop.f32.mrf.mxu1  ;;  %v4118_v13 = vadd.f32 %v4081_v51, %v3965_v32  ;;  %v4124_v50 = vadd.f32 %v6959_v27, %v3971_v26  ;;  %v6085_v27 = vmov 0.0   ;;  %v4458_v41 = vshrl.u32 %v4457_v0, 7 }
 0x58e   : > { %v4269_v44 = vadd.f32 %v5779_v5, %v4116_v47  ;;  %5792 = vmatprep.mubr.msk.bf16.mxu0 %vm1866_vm2, %v4294_v54  ;;  %v4282_v38 = vmax.f32 %v4266_v18, 0.0  ;;  %5808 = vmatprep.subr.bf16.mxu1 %v6085_v27  ;;  %v4456_v47 = vunpack.c.l.bf16 %v4455_v16  ;;  %v2856_v5 = vadd.f32 %v6846_v63, %v6738_v61  ;;  %v7163_v61 = vld [vmem:[#allocation20_spill] sm:$0xff] }
 0x58f   : > { %v4218_v28 = vpop.f32.mrf.mxu1  ;;  %5793 = vmatmul.mubr.msk.bf16.vlgmr.msra.gmra.mxu0 %vm1866_vm2, %v4295_v9  ;;  %5824 = vmatprep.mubr.msk.bf16.mxu1 %vm6086_vm3, %v6085_v27  ;;  %v4459_v54 = vsub.s32 0, %v4458_v41  ;;  %v2859_v18 = vadd.f32 %v6855_v55, %v6744_v8  ;;  %v2872_v63 = vadd.f32 %v7163_v61, %v6748_v6  ;;  %v7181_v61 = vld [vmem:[#allocation25_spill] sm:$0xff] }
 0x590   : > { %v4285_v24 = vmax.f32 %v4269_v44, 0.0  ;;  %v4267_v40 = vadd.f32 %v4218_v28, %v4114_v20 }
 0x591   : > { %v5782_v1 = vpop.f32.mrf.mxu1  ;;  %v7001_v28 = vrot.slane %v4456_v47, %v4459_v54 }
 0x592   : > { %v4297_v22 = vpack.c.bf16 %v4285_v24, %v4284_v52  ;;  %v4283_v37 = vmax.f32 %v4267_v40, 0.0  ;;  %v4272_v62 = vadd.f32 %v5782_v1, %v4119_v33 }
 0x593   : > { %v4231_v7 = vpop.f32.mrf.mxu1 }
 0x594   : > { %v4296_v34 = vpack.c.bf16 %v4283_v37, %v4282_v38  ;;  %v4270_v12 = vadd.f32 %v4231_v7, %v4117_v2  ;;  %v4288_v39 = vmax.f32 %v4272_v62, 0.0  ;;  %v7164_v38 = vld [vmem:[#allocation8_spill] sm:$0xff] }
 0x595   : > { %v5783_v42 = vpop.f32.mrf.mxu1 }
 0x596   : > { %v4273_v48 = vadd.f32 %v5783_v42, %v4120_v36  ;;  %5796 = vmatprep.mubr.msk.bf16.mxu0 %vm1866_vm2, %v4296_v34  ;;  %v4286_v10 = vmax.f32 %v4270_v12, 0.0  ;;  %v7167_v12 = vld [vmem:[#allocation24_spill] sm:$0xff] }
 0x597   : > { %v4234_v43 = vpop.f32.mrf.mxu1  ;;  %5797 = vmatmul.mubr.msk.bf16.gmra.mxu0 %vm1866_vm2, %v4297_v22  ;;  %v7165_v22 = vld [vmem:[#allocation22_spill] sm:$0xff] }
 0x598   : > { %v4289_v14 = vmax.f32 %v4273_v48, 0.0  ;;  %v4271_v4 = vadd.f32 %v4234_v43, %v4118_v13  ;;  %v2875_v37 = vadd.f32 %v7165_v22, %v7164_v38  ;;  %v7166_v13 = vld [vmem:[#allocation10_spill] sm:$0xff] }
 0x599   : > { %v5786_v46 = vpop.f32.mrf.mxu1  ;;  %v2888_v48 = vadd.f32 %v7167_v12, %v7166_v13  ;;  %v7185_v13 = vld [vmem:[#allocation21_spill] sm:$0xff] }
 0x59a   : > { %v4299_v35 = vpack.c.bf16 %v4289_v14, %v4288_v39  ;;  %v4287_v51 = vmax.f32 %v4271_v4, 0.0  ;;  %v4276_v30 = vadd.f32 %v5786_v46, %v4123_v25  ;;  %v7168_v39 = vld [vmem:[#allocation12_spill] sm:$0xff]  ;;  %v7169_v14 = vld [vmem:[#allocation26_spill] sm:$0xff] }
 0x59b   : > { %v4247_v53 = vpop.f32.mrf.mxu1  ;;  %v2891_v4 = vadd.f32 %v7169_v14, %v7168_v39 }
 0x59c   : > { %v4298_v29 = vpack.c.bf16 %v4287_v51, %v4286_v10  ;;  %v4274_v3 = vadd.f32 %v4247_v53, %v4121_v56  ;;  %v4292_v31 = vmax.f32 %v4276_v30, 0.0  ;;  %v7170_v53 = vld [vmem:[#allocation14_spill] sm:$0xff]  ;;  %v7171_v56 = vld [vmem:[#allocation28_spill] sm:$0xff] }
 0x59d   : > { %v5787_v15 = vpop.f32.mrf.mxu1 }
 0x59e   : > { %v4277_v9 = vadd.f32 %v5787_v15, %v4124_v50  ;;  %5800 = vmatprep.mubr.msk.bf16.mxu0 %vm1866_vm2, %v4298_v29  ;;  %v4290_v21 = vmax.f32 %v4274_v3, 0.0  ;;  %v2904_v50 = vadd.f32 %v7171_v56, %v7170_v53  ;;  %v7172_v15 = vld [vmem:[#allocation16_spill] sm:$0xff] }
 0x59f   : > { %v4250_v57 = vpop.f32.mrf.mxu1  ;;  %5801 = vmatmul.mubr.msk.bf16.gmra.mxu0 %vm1866_vm2, %v4299_v35 }
 0x5a0   : > { %v4293_v60 = vmax.f32 %v4277_v9, 0.0  ;;  %v4275_v59 = vadd.f32 %v4250_v57, %v4122_v45  ;;  %v7173_v45 = vld [vmem:[#allocation30_spill] sm:$0xff] }
 0x5a1   : > { %v2907_v3 = vadd.f32 %v7173_v45, %v7172_v15 }
 0x5a2   : > { %v4301_v58 = vpack.c.bf16 %v4293_v60, %v4292_v31  ;;  %v4291_v49 = vmax.f32 %v4275_v59, 0.0  ;;  %v7174_v31 = vld [vmem:[#allocation15_spill] sm:$0xff]  ;;  %v7175_v60 = vld [vmem:[#allocation29_spill] sm:$0xff] }
 0x5a3   : > { %v2896_v59 = vadd.f32 %v7175_v60, %v7174_v31 }
 0x5a4   : > { %v4300_v23 = vpack.c.bf16 %v4291_v49, %v4290_v21  ;;  %v7176_v21 = vld [vmem:[#allocation17_spill] sm:$0xff] }
 0x5a6   : > { %5804 = vmatprep.mubr.msk.bf16.mxu0 %vm1866_vm2, %v4300_v23 }
 0x5a7   : > { %5805 = vmatmul.mubr.msk.bf16.gmra.mxu0 %vm1866_vm2, %v4301_v58  ;;  %v7177_v58 = vld [vmem:[#allocation31_spill] sm:$0xff] }
 0x5a8   : > { %v2899_v49 = vadd.f32 %v7177_v58, %v7176_v21 }
 0x64f   : > { %v5794_v11 = vpop.f32.mrf.mxu0 }
 0x650   : > { %v4441_v44 = vadd.f32 %v5794_v11, %v2856_v5 }
 0x651   : > { %v6997_v20 = vpop.f32.mrf.mxu0 }
 0x652   : > { %v7006_v17 = vadd.f32 %v7001_v28, %v4441_v44  ;;  %v7179_v44 = vld [vmem:[#allocation27_spill] sm:$0xff] }
 0x653   : > { %v5795_v52 = vpop.f32.mrf.mxu0 }
 0x654   : > { %v4442_v24 = vadd.f32 %v5795_v52, %v2859_v18  ;;  %v7178_v18 = vld [vmem:[#allocation13_spill] sm:$0xff] }
 0x655   : > { %v7003_v40 = vpop.f32.mrf.mxu0  ;;  %v2883_v52 = vadd.f32 %v7179_v44, %v7178_v18 }
 0x656   : > { %v7009_v1 = vadd.f32 %v7001_v28, %v4442_v24 }
 0x657   : > { %v5798_v33 = vpop.f32.mrf.mxu0 }
 0x658   : > { %v4479_v8 = vpack.c.bf16 %v7009_v1, %v7006_v17  ;;  %v4445_v32 = vadd.f32 %v5798_v33, %v2872_v63  ;;  %v7180_v33 = vld [vmem:[#allocation11_spill] sm:$0xff] }
 0x659   : > { %v4392_v55 = vpop.f32.mrf.mxu0  ;;  %v2880_v63 = vadd.f32 %v7181_v61, %v7180_v33 }
 0x65a   : > { %v4467_v34 = vadd.f32 %v7001_v28, %v4445_v32 }
 0x65b   : > { %v5799_v7 = vpop.f32.mrf.mxu0 }
 0x65c   : > { %v4446_v2 = vadd.f32 %v5799_v7, %v2875_v37  ;;  %v7182_v7 = vld [vmem:[#allocation9_spill] sm:$0xff] }
 0x65d   : > { %v4395_v36 = vpop.f32.mrf.mxu0 }
 0x65e   : > { %v4468_v62 = vadd.f32 %v7001_v28, %v4446_v2  ;;  %v7183_v2 = vld [vmem:[#allocation23_spill] sm:$0xff] }
 0x65f   : > { %v5802_v42 = vpop.f32.mrf.mxu0 }
 0x660   : > { %v4481_v6 = vpack.c.bf16 %v4468_v62, %v4467_v34  ;;  %v4449_v26 = vadd.f32 %v5802_v42, %v2888_v48  ;;  %v2867_v34 = vadd.f32 %v7183_v2, %v7182_v7  ;;  %v7184_v42 = vld [vmem:[#allocation7_spill] sm:$0xff] }
 0x661   : > { %v4408_v43 = vpop.f32.mrf.mxu0  ;;  %v2864_v12 = vadd.f32 %v7185_v13, %v7184_v42 }
 0x662   : > { %v4471_v35 = vadd.f32 %v7001_v28, %v4449_v26  ;;  %v4447_v37 = vadd.f32 %v4408_v43, %v2880_v63  ;;  %v4444_v48 = vadd.f32 %v4395_v36, %v2867_v34  ;;  %v7187_v26 = vld [vmem:[#allocation19_spill] sm:$0xff] }
 0x663   : > { %v5803_v46 = vpop.f32.mrf.mxu0  ;;  %v4443_v43 = vadd.f32 %v4392_v55, %v2864_v12 }
 0x664   : > { %v4450_v25 = vadd.f32 %v5803_v46, %v2891_v4  ;;  %v4469_v62 = vadd.f32 %v7001_v28, %v4447_v37  ;;  %v4466_v14 = vadd.f32 %v7001_v28, %v4444_v48  ;;  %v7186_v4 = vld [vmem:[#allocation6_spill] sm:$0xff] }
 0x665   : > { %v4411_v10 = vpop.f32.mrf.mxu0  ;;  %v2851_v46 = vadd.f32 %v7187_v26, %v7186_v4 }
 0x666   : > { %v4472_v51 = vadd.f32 %v7001_v28, %v4450_v25  ;;  %v4448_v38 = vadd.f32 %v4411_v10, %v2883_v52  ;;  %v4465_v25 = vadd.f32 %v7001_v28, %v4443_v43  ;;  %v7188_v10 = vld [vmem:[#allocation5_spill] sm:$0xff] }
 0x667   : > { %v5806_v19 = vpop.f32.mrf.mxu0  ;;  %v4440_v36 = vadd.f32 %v7003_v40, %v2851_v46 }
 0x668   : > { %v4483_v29 = vpack.c.bf16 %v4472_v51, %v4471_v35  ;;  %v4453_v9 = vadd.f32 %v5806_v19, %v2904_v50  ;;  %v4470_v32 = vadd.f32 %v7001_v28, %v4448_v38  ;;  %v7189_v35 = vld [vmem:[#allocation18_spill] sm:$0xff]  ;;  %v4480_v55 = vpack.c.bf16 %v4466_v14, %v4465_v25 }
 0x669   : > { %v4424_v30 = vpop.f32.mrf.mxu0  ;;  %v2848_v51 = vadd.f32 %v7189_v35, %v7188_v10  ;;  %v4462_v53 = vadd.f32 %v7001_v28, %v4440_v36 }
 0x66a   : > { %v4475_v41 = vadd.f32 %v7001_v28, %v4453_v9  ;;  %v4451_v16 = vadd.f32 %v4424_v30, %v2896_v59  ;;  %v4482_v39 = vpack.c.bf16 %v4470_v32, %v4469_v62 }
 0x66b   : > { %v5807_v57 = vpop.f32.mrf.mxu0  ;;  %v4439_v19 = vadd.f32 %v6997_v20, %v2848_v51  ;;  %v4477_v20 = vld [vmem:[%s373_s15] sm:$0xf] }
 0x66c   : > { %v4454_v23 = vadd.f32 %v5807_v57, %v2907_v3  ;;  %v4473_v24 = vadd.f32 %v7001_v28, %v4451_v16 }
 0x66d   : > { %v4427_v0 = vpop.f32.mrf.mxu0 }
 0x66e   : > { %v4476_v47 = vadd.f32 %v7001_v28, %v4454_v23  ;;  %v4452_v54 = vadd.f32 %v4427_v0, %v2899_v49 }
 0x670   : > { %v4485_v11 = vpack.c.bf16 %v4476_v47, %v4475_v41  ;;  %v4474_v5 = vadd.f32 %v7001_v28, %v4452_v54 }
 0x672   : > { %5809 = vmatpush3.bf16.msra.mxu1 %v4485_v11  ;;  %v4484_v22 = vpack.c.bf16 %v4474_v5, %v4473_v24 }
 0x673   : > { %5810 = vmatprep.subr.bf16.mxu1 %v6085_v27 }
 0x676   : > { %5811 = vmatpush3.bf16.msra.mxu1 %v4484_v22 }
 0x677   : > { %5812 = vmatprep.subr.bf16.mxu1 %v6085_v27 }
 0x67a   : > { %5813 = vmatpush3.bf16.msra.mxu1 %v4483_v29 }
 0x67b   : > { %5814 = vmatprep.subr.bf16.mxu1 %v6085_v27 }
 0x67e   : > { %5815 = vmatpush3.bf16.msra.mxu1 %v4482_v39 }
 0x67f   : > { %5816 = vmatprep.subr.bf16.mxu1 %v6085_v27 }
 0x682   : > { %5817 = vmatpush3.bf16.msra.mxu1 %v4481_v6  ;;  %v4461_v6 = vadd.f32 %v7001_v28, %v4439_v19 }
 0x683   : > { %5818 = vmatprep.subr.bf16.mxu1 %v6085_v27 }
 0x684   : > { %v4478_v40 = vpack.c.bf16 %v4462_v53, %v4461_v6 }
 0x686   : > { %5819 = vmatpush3.bf16.msra.mxu1 %v4480_v55 }
 0x687   : > { %5820 = vmatprep.subr.bf16.mxu1 %v6085_v27 }
 0x68a   : > { %5821 = vmatpush3.bf16.msra.mxu1 %v4479_v8 }
 0x68b   : > { %5822 = vmatprep.subr.bf16.mxu1 %v6085_v27 }
 0x68e   : > { %5823 = vmatpush3.bf16.msra.mxu1 %v4478_v40 }
 0x691   : > { %5825 = vmatmul.mubr.bf16.vlgmr.msra.gmra.mxu1 %v4477_v20 }
 0x751   : > { %v4520_v27 = vpop.f32.mrf.mxu1 }
 0x752   : > { %4526 = vst.msk [vmem:[%s344_s29] sm:$0xff] %vm1866_vm2, %v4520_v27 }
 0x753   : > { %v5826_v28 = vpop.f32.mrf.mxu1 }
 0x754   : > { %6036 = shalt.err (!%p6033_p3)
}
 0x755   : > { %s6037_s14 = scalar_lea.hbm %s7076_s23, 128  ;;  %s6041_s19 = scalar_lea.hbm %s7125_s7, 256 }
 0x756   : > { %p6038_p4 = scmp.ne.s32.totalorder %s7076_s23, %s6037_s14  ;;  %p6042_p9 = scmp.lt.s32.totalorder %s7076_s23, %s7125_s7 }
 0x757   : > { %p6043_p10 = scmp.lt.s32.totalorder %s6041_s19, %s6037_s14 }
 0x758   : > { %p6039_p7 = pnand %p6038_p4, %p6166_p5 }
 0x759   : > { %p6044_p11 = por %p6043_p10, %p6042_p9 }
 0x75a   : > { %p6040_p8 = pneg %p6039_p7 }
 0x75c   : > { %p6045_p12 = pnand %p6044_p11, %p6040_p8 }
 0x75e   : > { %6048 = shalt.err (!%p6045_p12)
}
 0x75f   : > { %5829 = dma.vmem_to_hbm [thread:$0]  (%p6166_p5), %s7078_s20, 128, %s7076_s23, %s4528_s8   ;;  %v4523_v17 = vpop.f32.mrf.mxu1 }
 0x761   : > { %v5827_v1 = vpop.f32.mrf.mxu1 }
 0x762 PF: > { %p5835_p13 = scmp.ge.s32.totalorder %s6083_s27, 2  ;;  %s4553_s21 = sand.u32 1, %s6071_s24  }
 0x763   : > { %s4554_s22 = scalar_lea.sflag [#allocation3], %s4553_s21 }
 0x764   : > { %p5832_p0 = pnand %p5835_p13, %p6170_p6 }
 0x766   : > { %p5833_p1 = pneg %p5832_p0 }
 0x768   : > { %6066 = dma.done.wait (%p5833_p1), %s4554_s22, 128  }
 0x769   : > { %6068 = vsyncadd (%p5833_p1), %s4554_s22, 4294967168  ;;  %p17_p5 = scmp.ge.s32.totalorder %s6153_s30, 4   ;;  %s7190_s24 = smov %s6075_s25 }
 0x76a   : > { %s7191_s25 = smov %s6079_s26  ;;  %s7192_s26 = smov %s6164_s10 }
 0x76b   : > { %s7193_s27 = smov %s6153_s30  ;;  %19 = sbr.rel (!%p17_p5) target bundleno = 3 (0x3), region = 98 }
 0x770   :  { %4559 = vsyncpa [#allocation3], 1 }
 0x771   :  { %4561 = vsyncpa [#allocation3 + $0x1], 1 }

</bundles_post_ra>
